<compile_context>
chip_gen: v6e
topology: v6e:2x2x1
jax: 0.10.0
libtpu: 0.0.40
codegen_flags: <defaults>
</compile_context>

<pallas_src>
import jax
import jax.numpy as jnp
from jax import lax
from jax.experimental import pallas as pl
from jax.experimental.pallas import tpu as pltpu

LN_EPS = 1e-5  # torch.nn.LayerNorm default


def _layernorm(x, gamma, beta):
    mu = jnp.mean(x, axis=-1, keepdims=True)
    d = x - mu                                         # reuse (x - mu) once
    var = jnp.mean(d * d, axis=-1, keepdims=True)      # biased var (torch)
    return d * lax.rsqrt(var + LN_EPS) * gamma + beta


def _round_up(x, m):
    return -(-x // m) * m


def _make_critic_kernel(fc1, fc2):
    fc12 = fc1 + fc2

    def kernel(x_ref, w_in_ref, w2_ref, vecs_ref, bq_ref, out_ref):
        # Fused first stage: [state@w1 | action@wa] + [b1 | ba], one MXU pass.
        z = jnp.dot(x_ref[...], w_in_ref[...],
                    preferred_element_type=jnp.float32)
        z = z + vecs_ref[0:1, :fc12]                   # merged bias row

        h = z[:, :fc1]                                 # state branch, pre-LN1
        a = jnp.maximum(z[:, fc1:fc12], 0.0)           # relu(action branch)

        # LN1 -> relu -> fc2 -> LN2   (f32 math, bf16 MXU operands)
        h = _layernorm(h, vecs_ref[1:2, :fc1], vecs_ref[2:3, :fc1])
        h = jnp.maximum(h, 0.0)
        h = jnp.dot(h.astype(jnp.bfloat16), w2_ref[...],
                    preferred_element_type=jnp.float32) + vecs_ref[3:4, :fc2]
        h = _layernorm(h, vecs_ref[4:5, :fc2], vecs_ref[5:6, :fc2])

        # combine + relu (no relu on the state branch before the add,
        # matching the module)
        sa = jnp.maximum(h + a, 0.0)                   # (tile_b, fc2)

        # Q head with batch on LANES: (1,fc2).(tile_b,fc2)^T -> (1, tile_b).
        wq = vecs_ref[6:7, :fc2].astype(jnp.bfloat16)
        q = lax.dot_general(wq, sa.astype(jnp.bfloat16),
                            (((1,), (1,)), ((), ())),
                            preferred_element_type=jnp.float32)
        out_ref[...] = (q + bq_ref[0]).astype(out_ref.dtype)

    return kernel


def critic_forward(state, action, params, *, tile_b=None, target_grid=1,
                   max_tile_b=2048):
    B, input_dims = state.shape
    n_actions = action.shape[1]
    fc1 = params["w1"].shape[1]
    fc2 = params["w2"].shape[1]
    fc12 = fc1 + fc2
    in_act = input_dims + n_actions

    # Tile selection: default is one grid step covering the whole batch
    # (this kernel is per-step-overhead bound); target_grid=2 keeps two
    # "parallel" steps for v7x dual-TC sharding.
    if tile_b is None:
        b_min = _round_up(B, 128)
        tile_b = min(max_tile_b,
                     max(128, _round_up(-(-b_min // max(target_grid, 1)), 128)))
    assert tile_b % 128 == 0, "tile_b must be a multiple of 128 (lane width)"
    b_pad = _round_up(B, tile_b)

    # Fused activation input [state | action] in bf16 (one DMA per step).
    # Padded zero rows go through LayerNorm as finite values and are sliced off.
    x = jnp.concatenate([state.astype(jnp.float32),
                         action.astype(jnp.float32)], axis=1)
    if b_pad != B:
        x = jnp.pad(x, ((0, b_pad - B), (0, 0)))
    x = x.astype(jnp.bfloat16)

    # Block-diagonal first-stage weight [[w1, 0], [0, wa]] : (in+act, fc1+fc2).
    w_in = jnp.zeros((in_act, fc12), jnp.float32)
    w_in = w_in.at[:input_dims, :fc1].set(params["w1"].astype(jnp.float32))
    w_in = w_in.at[input_dims:, fc1:].set(params["wa"].astype(jnp.float32))
    w_in = w_in.astype(jnp.bfloat16)
    w2 = params["w2"].astype(jnp.bfloat16)

    # Pack the 1-row params into one resident (7, fc1+fc2) f32 block.
    def row(v):
        v = jnp.asarray(v, jnp.float32).reshape(1, -1)
        return jnp.pad(v, ((0, 0), (0, fc12 - v.shape[1])))

    bias_in = jnp.concatenate(
        [jnp.asarray(params["b1"], jnp.float32).reshape(1, -1),
         jnp.asarray(params["ba"], jnp.float32).reshape(1, -1)], axis=1)
    vecs = jnp.concatenate([
        bias_in,                                    # row 0: [b1 | ba]
        row(params["g1"]), row(params["be1"]),      # rows 1-2: LN1 scale/shift
        row(params["b2"]),                          # row 3: fc2 bias
        row(params["g2"]), row(params["be2"]),      # rows 4-5: LN2 scale/shift
        row(params["wq"].reshape(1, -1)),           # row 6: q-head weight
    ], axis=0)                                      # (7, fc12) f32
    bq = jnp.asarray(params["bq"], jnp.float32).reshape(-1)[:1]   # (1,) SMEM

    flops = int(2 * b_pad * (in_act * fc12 + fc1 * fc2 + fc2))
    bytes_accessed = int(2 * (b_pad * in_act + w_in.size + w2.size)
                         + 4 * (b_pad + vecs.size + 1))

    q_row = pl.pallas_call(
        _make_critic_kernel(fc1, fc2),
        out_shape=jax.ShapeDtypeStruct((1, b_pad), jnp.float32),
        grid=(b_pad // tile_b,),
        in_specs=[
            pl.BlockSpec((tile_b, in_act), lambda i: (i, 0)),   # [state|action]
            pl.BlockSpec((in_act, fc12), lambda i: (0, 0)),     # block-diag w1/wa
            pl.BlockSpec((fc1, fc2), lambda i: (0, 0)),         # w2, resident
            pl.BlockSpec((7, fc12), lambda i: (0, 0)),          # packed rows
            pl.BlockSpec(memory_space=pltpu.MemorySpace.SMEM),  # bq scalar
        ],
        out_specs=pl.BlockSpec((1, tile_b), lambda i: (0, i)),  # lane-dense out
        compiler_params=pltpu.CompilerParams(
            dimension_semantics=("parallel",)),                 # v7x dual-TC
        cost_estimate=pl.CostEstimate(
            flops=flops, transcendentals=int(2 * b_pad),
            bytes_accessed=bytes_accessed),
    )(x, w_in, w2, vecs, bq)

    # Wrapper-side layout plumbing back to the module's (B, 1) output.
    return q_row[0, :B][:, None]


def init_params(key, input_dims, fc1_dims, fc2_dims, n_actions):
    """Deterministic init mirroring the module's __init__ (uniform ranges)."""
    ks = jax.random.split(key, 8)
    f1 = 1.0 / jnp.sqrt(fc1_dims)       # torch code: 1/sqrt(fc1.weight.size(0))
    f2 = 1.0 / jnp.sqrt(fc2_dims)       # torch code: 1/sqrt(fc2.weight.size(0))
    f3 = 0.003
    fa = 1.0 / jnp.sqrt(n_actions)      # torch default Linear init bound

    def u(k, shape, bound):
        return jax.random.uniform(k, shape, jnp.float32, -bound, bound)

    return {
        # weights stored [in, out] (transpose of torch's [out, in])
        "w1": u(ks[0], (input_dims, fc1_dims), f1),
        "b1": u(ks[1], (1, fc1_dims), f1),
        "g1": jnp.ones((1, fc1_dims), jnp.float32),    # LayerNorm weight
        "be1": jnp.zeros((1, fc1_dims), jnp.float32),  # LayerNorm bias
        "w2": u(ks[2], (fc1_dims, fc2_dims), f2),
        "b2": u(ks[3], (1, fc2_dims), f2),
        "g2": jnp.ones((1, fc2_dims), jnp.float32),
        "be2": jnp.zeros((1, fc2_dims), jnp.float32),
        "wa": u(ks[4], (n_actions, fc2_dims), fa),
        "ba": u(ks[5], (1, fc2_dims), fa),
        "wq": u(ks[6], (fc2_dims, 1), f3),
        "bq": u(ks[7], (1, 1), f3),
    }


def reference_forward(state, action, p):
    """Pure-JAX f32 reference with the module's exact forward semantics."""
    h = state @ p["w1"] + p["b1"]
    h = _layernorm(h, p["g1"], p["be1"])
    h = jnp.maximum(h, 0.0)
    h = h @ p["w2"] + p["b2"]
    h = _layernorm(h, p["g2"], p["be2"])
    a = jnp.maximum(action @ p["wa"] + p["ba"], 0.0)
    sa = jnp.maximum(h + a, 0.0)
    return sa @ p["wq"] + p["bq"]


if __name__ == "__main__":
    # Small MLP shapes consistent with the module; B=200 exercises padding.
    B, INPUT_DIMS, FC1, FC2, N_ACTIONS = 200, 16, 64, 32, 4

    key = jax.random.PRNGKey(0)
    k_s, k_a, k_p = jax.random.split(key, 3)
    state = jax.random.normal(k_s, (B, INPUT_DIMS), jnp.float32)
    action = jax.random.normal(k_a, (B, N_ACTIONS), jnp.float32)
    params = init_params(k_p, INPUT_DIMS, FC1, FC2, N_ACTIONS)

    q_ref = reference_forward(state, action, params)

    # Default: single grid step covering the whole batch (v5e/v6e best case).
    q1 = jax.block_until_ready(critic_forward(state, action, params))
    # v7x-style: two grid steps so the "parallel" batch axis can split TCs.
    q2 = jax.block_until_ready(
        critic_forward(state, action, params, target_grid=2))

    assert q1.shape == (B, 1) and q2.shape == (B, 1)
    # bf16 MXU operands (f32 accumulation) -> relaxed tolerance vs f32 ref.
    assert jnp.allclose(q1, q_ref, atol=3e-3, rtol=3e-2), (
        float(jnp.max(jnp.abs(q1 - q_ref))))
    assert jnp.allclose(q2, q_ref, atol=3e-3, rtol=3e-2), (
        float(jnp.max(jnp.abs(q2 - q_ref))))
    # Tiling must not change per-row results.
    assert jnp.allclose(q1, q2, atol=1e-5, rtol=1e-5)

    print("KERNEL_OK")
</pallas_src>

<mosaic_0001>
module attributes {stable_mosaic.version = 11 : i64} {
  func.func @kernel(%arg0: i32, %arg1: memref<256x20xbf16, #tpu.memory_space<vmem>>, %arg2: memref<20x96xbf16, #tpu.memory_space<vmem>>, %arg3: memref<64x32xbf16, #tpu.memory_space<vmem>>, %arg4: memref<7x96xf32, #tpu.memory_space<vmem>>, %arg5: memref<1xf32, #tpu.memory_space<smem>>, %arg6: memref<1x256xf32, #tpu.memory_space<vmem>>) attributes {dimension_semantics = [#tpu.dimension_semantics<parallel>], iteration_bounds = array<i64: 1>, scalar_prefetch = 0 : i64, scratch_operands = 0 : i64, tpu.core_type = #tpu.core_type<tc>, window_params = [{transform_indices = @transform_0, window_bounds = array<i64: 256, 20>}, {pipeline_mode = #tpu.pipeline_mode<synchronous>, transform_indices = @transform_1, window_bounds = array<i64: 20, 96>}, {pipeline_mode = #tpu.pipeline_mode<synchronous>, transform_indices = @transform_2, window_bounds = array<i64: 64, 32>}, {pipeline_mode = #tpu.pipeline_mode<synchronous>, transform_indices = @transform_3, window_bounds = array<i64: 7, 96>}, {transform_indices = @transform_4, window_bounds = array<i64: 1>}, {transform_indices = @transform_5, window_bounds = array<i64: 1, 256>}]} {
    %c0 = arith.constant 0 : index
    %c0_0 = arith.constant 0 : index
    %0 = vector.load %arg1[%c0, %c0_0] : memref<256x20xbf16, #tpu.memory_space<vmem>>, vector<256x20xbf16>
    %c0_1 = arith.constant 0 : index
    %c0_2 = arith.constant 0 : index
    %1 = vector.load %arg2[%c0_1, %c0_2] : memref<20x96xbf16, #tpu.memory_space<vmem>>, vector<20x96xbf16>
    %cst = arith.constant dense<0.000000e+00> : vector<256x96xf32>
    %2 = tpu.matmul %0, %1, %cst {dimension_numbers = #tpu.dot_dimension_numbers<[1], [0], [0], [1], [0, 0, 1, 1], [], []>} : vector<256x20xbf16>, vector<20x96xbf16>, vector<256x96xf32> -> vector<256x96xf32>
    %c0_3 = arith.constant 0 : index
    %c0_4 = arith.constant 0 : index
    %3 = vector.load %arg4[%c0_3, %c0_4] : memref<7x96xf32, #tpu.memory_space<vmem>>, vector<1x96xf32>
    %4 = vector.broadcast %3 : vector<1x96xf32> to vector<256x96xf32>
    %5 = arith.addf %2, %4 : vector<256x96xf32>
    %6 = vector.extract_strided_slice %5 {offsets = [0, 0], sizes = [256, 64], strides = [1, 1]} : vector<256x96xf32> to vector<256x64xf32>
    %7 = vector.extract_strided_slice %5 {offsets = [0, 64], sizes = [256, 32], strides = [1, 1]} : vector<256x96xf32> to vector<256x32xf32>
    %cst_5 = arith.constant 0.000000e+00 : f32
    %8 = vector.broadcast %cst_5 : f32 to vector<256x32xf32>
    %9 = arith.maximumf %7, %8 : vector<256x32xf32>
    %c1 = arith.constant 1 : index
    %c0_6 = arith.constant 0 : index
    %10 = vector.load %arg4[%c1, %c0_6] : memref<7x96xf32, #tpu.memory_space<vmem>>, vector<1x64xf32>
    %c2 = arith.constant 2 : index
    %c0_7 = arith.constant 0 : index
    %11 = vector.load %arg4[%c2, %c0_7] : memref<7x96xf32, #tpu.memory_space<vmem>>, vector<1x64xf32>
    %cst_8 = arith.constant dense<0.000000e+00> : vector<256xf32>
    %12 = vector.multi_reduction <add>, %6, %cst_8 [1] : vector<256x64xf32> to vector<256xf32>
    %13 = vector.shape_cast %12 : vector<256xf32> to vector<256x1xf32>
    %cst_9 = arith.constant 6.400000e+01 : f32
    %14 = vector.broadcast %cst_9 : f32 to vector<256x1xf32>
    %15 = arith.divf %13, %14 : vector<256x1xf32>
    %16 = vector.broadcast %15 : vector<256x1xf32> to vector<256x64xf32>
    %17 = arith.subf %6, %16 : vector<256x64xf32>
    %18 = arith.mulf %17, %17 : vector<256x64xf32>
    %cst_10 = arith.constant dense<0.000000e+00> : vector<256xf32>
    %19 = vector.multi_reduction <add>, %18, %cst_10 [1] : vector<256x64xf32> to vector<256xf32>
    %20 = vector.shape_cast %19 : vector<256xf32> to vector<256x1xf32>
    %cst_11 = arith.constant 6.400000e+01 : f32
    %21 = vector.broadcast %cst_11 : f32 to vector<256x1xf32>
    %22 = arith.divf %20, %21 : vector<256x1xf32>
    %cst_12 = arith.constant 9.99999974E-6 : f32
    %23 = vector.broadcast %cst_12 : f32 to vector<256x1xf32>
    %24 = arith.addf %22, %23 : vector<256x1xf32>
    %25 = math.rsqrt %24 : vector<256x1xf32>
    %26 = vector.broadcast %25 : vector<256x1xf32> to vector<256x64xf32>
    %27 = arith.mulf %17, %26 : vector<256x64xf32>
    %28 = vector.broadcast %10 : vector<1x64xf32> to vector<256x64xf32>
    %29 = arith.mulf %27, %28 : vector<256x64xf32>
    %30 = vector.broadcast %11 : vector<1x64xf32> to vector<256x64xf32>
    %31 = arith.addf %29, %30 : vector<256x64xf32>
    %cst_13 = arith.constant 0.000000e+00 : f32
    %32 = vector.broadcast %cst_13 : f32 to vector<256x64xf32>
    %33 = arith.maximumf %31, %32 : vector<256x64xf32>
    %34 = arith.truncf %33 : vector<256x64xf32> to vector<256x64xbf16>
    %c0_14 = arith.constant 0 : index
    %c0_15 = arith.constant 0 : index
    %35 = vector.load %arg3[%c0_14, %c0_15] : memref<64x32xbf16, #tpu.memory_space<vmem>>, vector<64x32xbf16>
    %cst_16 = arith.constant dense<0.000000e+00> : vector<256x32xf32>
    %36 = tpu.matmul %34, %35, %cst_16 {dimension_numbers = #tpu.dot_dimension_numbers<[1], [0], [0], [1], [0, 0, 1, 1], [], []>} : vector<256x64xbf16>, vector<64x32xbf16>, vector<256x32xf32> -> vector<256x32xf32>
    %c3 = arith.constant 3 : index
    %c0_17 = arith.constant 0 : index
    %37 = vector.load %arg4[%c3, %c0_17] : memref<7x96xf32, #tpu.memory_space<vmem>>, vector<1x32xf32>
    %38 = vector.broadcast %37 : vector<1x32xf32> to vector<256x32xf32>
    %39 = arith.addf %36, %38 : vector<256x32xf32>
    %c4 = arith.constant 4 : index
    %c0_18 = arith.constant 0 : index
    %40 = vector.load %arg4[%c4, %c0_18] : memref<7x96xf32, #tpu.memory_space<vmem>>, vector<1x32xf32>
    %c5 = arith.constant 5 : index
    %c0_19 = arith.constant 0 : index
    %41 = vector.load %arg4[%c5, %c0_19] : memref<7x96xf32, #tpu.memory_space<vmem>>, vector<1x32xf32>
    %cst_20 = arith.constant dense<0.000000e+00> : vector<256xf32>
    %42 = vector.multi_reduction <add>, %39, %cst_20 [1] : vector<256x32xf32> to vector<256xf32>
    %43 = vector.shape_cast %42 : vector<256xf32> to vector<256x1xf32>
    %cst_21 = arith.constant 3.200000e+01 : f32
    %44 = vector.broadcast %cst_21 : f32 to vector<256x1xf32>
    %45 = arith.divf %43, %44 : vector<256x1xf32>
    %46 = vector.broadcast %45 : vector<256x1xf32> to vector<256x32xf32>
    %47 = arith.subf %39, %46 : vector<256x32xf32>
    %48 = arith.mulf %47, %47 : vector<256x32xf32>
    %cst_22 = arith.constant dense<0.000000e+00> : vector<256xf32>
    %49 = vector.multi_reduction <add>, %48, %cst_22 [1] : vector<256x32xf32> to vector<256xf32>
    %50 = vector.shape_cast %49 : vector<256xf32> to vector<256x1xf32>
    %cst_23 = arith.constant 3.200000e+01 : f32
    %51 = vector.broadcast %cst_23 : f32 to vector<256x1xf32>
    %52 = arith.divf %50, %51 : vector<256x1xf32>
    %cst_24 = arith.constant 9.99999974E-6 : f32
    %53 = vector.broadcast %cst_24 : f32 to vector<256x1xf32>
    %54 = arith.addf %52, %53 : vector<256x1xf32>
    %55 = math.rsqrt %54 : vector<256x1xf32>
    %56 = vector.broadcast %55 : vector<256x1xf32> to vector<256x32xf32>
    %57 = arith.mulf %47, %56 : vector<256x32xf32>
    %58 = vector.broadcast %40 : vector<1x32xf32> to vector<256x32xf32>
    %59 = arith.mulf %57, %58 : vector<256x32xf32>
    %60 = vector.broadcast %41 : vector<1x32xf32> to vector<256x32xf32>
    %61 = arith.addf %59, %60 : vector<256x32xf32>
    %62 = arith.addf %61, %9 : vector<256x32xf32>
    %cst_25 = arith.constant 0.000000e+00 : f32
    %63 = vector.broadcast %cst_25 : f32 to vector<256x32xf32>
    %64 = arith.maximumf %62, %63 : vector<256x32xf32>
    %c6 = arith.constant 6 : index
    %c0_26 = arith.constant 0 : index
    %65 = vector.load %arg4[%c6, %c0_26] : memref<7x96xf32, #tpu.memory_space<vmem>>, vector<1x32xf32>
    %66 = arith.truncf %65 : vector<1x32xf32> to vector<1x32xbf16>
    %67 = arith.truncf %64 : vector<256x32xf32> to vector<256x32xbf16>
    %cst_27 = arith.constant dense<0.000000e+00> : vector<1x256xf32>
    %68 = tpu.matmul %66, %67, %cst_27 {dimension_numbers = #tpu.dot_dimension_numbers<[1], [1], [0], [0], [0, 0, 1, 0], [], []>} : vector<1x32xbf16>, vector<256x32xbf16>, vector<1x256xf32> -> vector<1x256xf32>
    %c0_28 = arith.constant 0 : index
    %69 = memref.load %arg5[%c0_28] : memref<1xf32, #tpu.memory_space<smem>>
    %70 = vector.broadcast %69 : f32 to vector<1x256xf32>
    %71 = arith.addf %68, %70 : vector<1x256xf32>
    %c0_29 = arith.constant 0 : index
    %c0_30 = arith.constant 0 : index
    %72 = vector.load %arg6[%c0_29, %c0_30] : memref<1x256xf32, #tpu.memory_space<vmem>>, vector<1x256xf32>
    tpu.vector_store %arg6[%c0_29, %c0_30], %71 {strides = array<i32>} : memref<1x256xf32, #tpu.memory_space<vmem>>, vector<1x256xf32>,
    return
  }
  func.func @transform_0(%arg0: i32) -> (i32, i32) {
    %c0_i32 = arith.constant 0 : i32
    %c0_i32_0 = arith.constant 0 : i32
    return %arg0, %c0_i32 : i32, i32
  }
  func.func @transform_1(%arg0: i32) -> (i32, i32) {
    %c0_i32 = arith.constant 0 : i32
    %c0_i32_0 = arith.constant 0 : i32
    %c0_i32_1 = arith.constant 0 : i32
    return %c0_i32, %c0_i32_0 : i32, i32
  }
  func.func @transform_2(%arg0: i32) -> (i32, i32) {
    %c0_i32 = arith.constant 0 : i32
    %c0_i32_0 = arith.constant 0 : i32
    %c0_i32_1 = arith.constant 0 : i32
    return %c0_i32, %c0_i32_0 : i32, i32
  }
  func.func @transform_3(%arg0: i32) -> (i32, i32) {
    %c0_i32 = arith.constant 0 : i32
    %c0_i32_0 = arith.constant 0 : i32
    %c0_i32_1 = arith.constant 0 : i32
    return %c0_i32, %c0_i32_0 : i32, i32
  }
  func.func @transform_4(%arg0: i32) -> i32 {
    %c0_i32 = arith.constant 0 : i32
    %c0_i32_0 = arith.constant 0 : i32
    return %c0_i32 : i32
  }
  func.func @transform_5(%arg0: i32) -> (i32, i32) {
    %c0_i32 = arith.constant 0 : i32
    %c0_i32_0 = arith.constant 0 : i32
    return %c0_i32, %arg0 : i32, i32
  }
}

</mosaic_0001>

<bundles_post_ra>
// kernel: tpu_custom_call.1
= control target key start
LH: loop header
LB: loop body
LE: loop exit
PB: predicated region body
PF: predicated region fallthrough
CT: control target
= control target key end

     0   :  { %vm201_vm0 = vcmask 1041408   ;;  %vm152_vm1 = vcmask 162816   ;;  %s3654_s0 = inlined_call_operand.vmem [shape: bf16[256,20], index: 0, kind: input, shape index: {}]   ;;  %s3655_s1 = inlined_call_operand.vmem [shape: bf16[20,96], index: 1, kind: input, shape index: {}]   ;;  %s3656_s2 = inlined_call_operand.vmem [shape: bf16[64,32], index: 2, kind: input, shape index: {}]   ;;  %s3657_s3 = inlined_call_operand.vmem [shape: f32[7,96], index: 3, kind: input, shape index: {}]   ;;  %s3658_s4 = inlined_call_operand.<no memory space> [shape: f32[1], index: 4, kind: input, shape index: {}]   ;;  %s3659_s5 = inlined_call_operand.hbm [shape: f32[1,256], index: 5, kind: output, shape index: {}]  }
   0x1   :  { %v2222_v0 = vld [vmem:[%s3655_s1 + $0x8] ss:$0 sps:$4 sm:$0x33]   ;;  %v2223_v1 = vld [vmem:[%s3655_s1] sm:$0xff]   ;;  %v2226_v5 = vld [vmem:[%s3654_s0 + $0x10] sm:$0xff]  }
   0x2   :  { %2210 = vmatprep.subr.msk.bf16.mxu0 %vm201_vm0, %v2222_v0  ;;  %v203_v2 = vsel %vm201_vm0, %v2222_v0, 0  ;;  %v2224_v3 = vld [vmem:[%s3654_s0] sm:$0xff]   ;;  %v2225_v4 = vld [vmem:[%s3654_s0 + $0x8] sm:$0xff]   ;;  %v2227_v6 = vld [vmem:[%s3654_s0 + $0x18] sm:$0xff]  }
   0x3   :  { %2135 = vmatpush3.bf16.msra.mxu0 %v203_v2  ;;  %2138 = vmatprep.mubr.msk.bf16.mxu0 %vm152_vm1, %v2224_v3  ;;  %v2228_v7 = vld [vmem:[%s3654_s0 + $0x20] sm:$0xff]  }
   0x4   :  { %2136 = vmatprep.subr.bf16.mxu0 %v2223_v1 }
   0x7   :  { %2137 = vmatpush3.bf16.msra.mxu0 %v2223_v1 }
   0xa   :  { %2139 = vmatmul.mubr.msk.bf16.vlgmr.msra.gmra.mxu0 %vm152_vm1, %v2225_v4 }
   0xb   :  { %2142 = vmatprep.mubr.msk.bf16.mxu0 %vm152_vm1, %v2226_v5 }
  0x12   :  { %2143 = vmatmul.mubr.msk.bf16.gmra.mxu0 %vm152_vm1, %v2227_v6 }
  0x13   :  { %2146 = vmatprep.mubr.msk.bf16.mxu0 %vm152_vm1, %v2228_v7 }
  0x14   :  { %11 = vsyncpa [#allocation4], 0  ;;  %v2229_v8 = vld [vmem:[%s3654_s0 + $0x28] sm:$0xff]   ;;  %v2230_v9 = vld [vmem:[%s3654_s0 + $0x30] sm:$0xff]   ;;  %vm400_vm2 = vcmask 523264   ;;  %vm1186_vm3 = vcmask 261120  }
  0x15   :  { %v2231_v10 = vld [vmem:[%s3654_s0 + $0x38] sm:$0xff]   ;;  %v2232_v11 = vld [vmem:[%s3654_s0 + $0x40] sm:$0xff]   ;;  %v2233_v12 = vld [vmem:[%s3654_s0 + $0x48] sm:$0xff]   ;;  %s2396_s24 = smov [#allocation3]  }
  0x16   :  { %v2234_v13 = vld [vmem:[%s3654_s0 + $0x50] sm:$0xff]   ;;  %v2235_v14 = vld [vmem:[%s3654_s0 + $0x58] sm:$0xff]   ;;  %v2236_v15 = vld [vmem:[%s3654_s0 + $0x60] sm:$0xff]   ;;  %s2009_s25 = sshll.u32 %s2396_s24, 4  ;;  %s2010_s25 = int_to_ptr.vmem [resolvable:$true] %s2009_s25 }
  0x17   :  { %v2237_v16 = vld [vmem:[%s3654_s0 + $0x68] sm:$0xff]   ;;  %v2238_v17 = vld [vmem:[%s3654_s0 + $0x70] sm:$0xff]   ;;  %v2239_v18 = vld [vmem:[%s3654_s0 + $0x78] sm:$0xff]   ;;  %s2372_s26 = scalar_lea.vmem %s2010_s25, 32  ;;  %p2377_p1 = scmp.lt.s32.totalorder %s2010_s25, %s2010_s25 }
  0x18   :  { %v2500_v19 = vld [vmem:[%s3657_s3] ss:$0 sm:$0xff]  ;;  %p2373_p0 = scmp.ne.s32.totalorder %s2010_s25, %s2372_s26  ;;  %p2378_p2 = scmp.lt.s32.totalorder %s2372_s26, %s2372_s26 }
  0x1a   :  { %2147 = vmatmul.mubr.msk.bf16.gmra.mxu0 %vm152_vm1, %v2229_v8  ;;  %p2379_p3 = por %p2378_p2, %p2377_p1 }
  0x1b   :  { %2150 = vmatprep.mubr.msk.bf16.mxu0 %vm152_vm1, %v2230_v9 }
  0x1c   :  { %p2380_p4 = pnand %p2379_p3, %p2373_p0 }
  0x22   :  { %2151 = vmatmul.mubr.msk.bf16.gmra.mxu0 %vm152_vm1, %v2231_v10 }
  0x23   :  { %2154 = vmatprep.mubr.msk.bf16.mxu0 %vm152_vm1, %v2232_v11 }
  0x2a   :  { %2155 = vmatmul.mubr.msk.bf16.gmra.mxu0 %vm152_vm1, %v2233_v12 }
  0x2b   :  { %2158 = vmatprep.mubr.msk.bf16.mxu0 %vm152_vm1, %v2234_v13 }
  0x32   :  { %2159 = vmatmul.mubr.msk.bf16.gmra.mxu0 %vm152_vm1, %v2235_v14 }
  0x33   :  { %2162 = vmatprep.mubr.msk.bf16.mxu0 %vm152_vm1, %v2236_v15 }
  0x3a   :  { %2163 = vmatmul.mubr.msk.bf16.gmra.mxu0 %vm152_vm1, %v2237_v16 }
  0x3b   :  { %2166 = vmatprep.mubr.msk.bf16.mxu0 %vm152_vm1, %v2238_v17 }
  0x42   :  { %2167 = vmatmul.mubr.msk.bf16.gmra.mxu0 %vm152_vm1, %v2239_v18 }
  0xca   :  { %v2140_v20 = vpop.f32.mrf.mxu0 }
  0xcb   :  { %v2503_v21 = vadd.f32 %v2140_v20, %v2500_v19 }
  0xcc   :  { %v239_v22 = vpop.f32.mrf.mxu0 }
  0xcd   :  { %v2506_v23 = vadd.f32 %v2500_v19, %v239_v22  ;;  %v407_v24 = vsel %vm400_vm2, %v2503_v21, 0.0 }
  0xce   :  { %408 = vadd.xlane.f32.xlu1 %v407_v24  ;;  %v2141_v25 = vpop.f32.mrf.mxu0 }
  0xcf   :  { %3690 = vst [vmem:[#allocation6_spill] sm:$0xff] %v2506_v23  ;;  %v2511_v26 = vadd.f32 %v2141_v25, %v2500_v19  ;;  %v401_v27 = vsel %vm400_vm2, %v2506_v23, 0.0 }
  0xd0   :  { %v242_v28 = vpop.f32.mrf.mxu0  ;;  %402 = vadd.xlane.f32.xlu0 %v401_v27 }
  0xd1   :  { %3691 = vst [vmem:[#allocation7_spill] sm:$0xff] %v2511_v26  ;;  %v2516_v29 = vadd.f32 %v2500_v19, %v242_v28  ;;  %v410_v30 = vsel %vm400_vm2, %v2511_v26, 0.0 }
  0xd2   :  { %411 = vadd.xlane.f32.xlu1 %v410_v30  ;;  %v2144_v31 = vpop.f32.mrf.mxu0 }
  0xd3   :  { %3692 = vst [vmem:[#allocation8_spill] sm:$0xff] %v2516_v29  ;;  %v404_v32 = vsel %vm400_vm2, %v2516_v29, 0.0  ;;  %v2526_v36 = vadd.f32 %v2144_v31, %v2500_v19 }
  0xd4   :  { %v255_v33 = vpop.f32.mrf.mxu0  ;;  %405 = vadd.xlane.f32.xlu0 %v404_v32 }
  0xd5   :  { %v2523_v34 = vadd.f32 %v2500_v19, %v255_v33  ;;  %v419_v43 = vsel %vm400_vm2, %v2526_v36, 0.0 }
  0xd6   :  { %v2145_v35 = vpop.f32.mrf.mxu0 }
  0xd7   :  { %v413_v37 = vsel %vm400_vm2, %v2523_v34, 0.0  ;;  %v2534_v41 = vadd.f32 %v2145_v35, %v2500_v19 }
  0xd8   :  { %v258_v38 = vpop.f32.mrf.mxu0  ;;  %414 = vadd.xlane.f32.xlu0 %v413_v37 }
  0xd9   :  { %v2531_v39 = vadd.f32 %v2500_v19, %v258_v38  ;;  %3694 = vst [vmem:[#allocation10_spill] sm:$0xff] %v2534_v41  ;;  %v422_v48 = vsel %vm400_vm2, %v2534_v41, 0.0 }
  0xda   :  { %v2148_v40 = vpop.f32.mrf.mxu0 }
  0xdb   :  { %3693 = vst [vmem:[#allocation9_spill] sm:$0xff] %v2531_v39  ;;  %v416_v42 = vsel %vm400_vm2, %v2531_v39, 0.0  ;;  %v2544_v47 = vadd.f32 %v2148_v40, %v2500_v19 }
  0xdc   :  { %v271_v44 = vpop.f32.mrf.mxu0  ;;  %417 = vadd.xlane.f32.xlu1 %v416_v42  ;;  %420 = vadd.xlane.f32.xlu0 %v419_v43 }
  0xdd   :  { %v2541_v45 = vadd.f32 %v2500_v19, %v271_v44  ;;  %v431_v55 = vsel %vm400_vm2, %v2544_v47, 0.0 }
  0xde   :  { %v2149_v46 = vpop.f32.mrf.mxu0 }
  0xdf   :  { %v425_v49 = vsel %vm400_vm2, %v2541_v45, 0.0  ;;  %v2554_v53 = vadd.f32 %v2149_v46, %v2500_v19 }
  0xe0   :  { %v274_v50 = vpop.f32.mrf.mxu0  ;;  %423 = vadd.xlane.f32.xlu1 %v422_v48  ;;  %426 = vadd.xlane.f32.xlu0 %v425_v49 }
  0xe1   :  { %v2551_v51 = vadd.f32 %v2500_v19, %v274_v50  ;;  %v434_v60 = vsel %vm400_vm2, %v2554_v53, 0.0 }
  0xe2   :  { %v2152_v52 = vpop.f32.mrf.mxu0 }
  0xe3   :  { %3695 = vst [vmem:[#allocation11_spill] sm:$0xff] %v2551_v51  ;;  %v428_v54 = vsel %vm400_vm2, %v2551_v51, 0.0  ;;  %v2564_v59 = vadd.f32 %v2152_v52, %v2500_v19 }
  0xe4   :  { %v287_v56 = vpop.f32.mrf.mxu0  ;;  %429 = vadd.xlane.f32.xlu1 %v428_v54  ;;  %432 = vadd.xlane.f32.xlu0 %v431_v55 }
  0xe5   :  { %v2561_v57 = vadd.f32 %v2500_v19, %v287_v56  ;;  %v443_v3 = vsel %vm400_vm2, %v2564_v59, 0.0 }
  0xe6   :  { %v2153_v58 = vpop.f32.mrf.mxu0 }
  0xe7   :  { %v437_v61 = vsel %vm400_vm2, %v2561_v57, 0.0  ;;  %v2574_v1 = vadd.f32 %v2153_v58, %v2500_v19 }
  0xe8   :  { %v290_v62 = vpop.f32.mrf.mxu0  ;;  %435 = vadd.xlane.f32.xlu1 %v434_v60  ;;  %438 = vadd.xlane.f32.xlu0 %v437_v61 }
  0xe9   :  { %v2571_v63 = vadd.f32 %v2500_v19, %v290_v62  ;;  %v446_v8 = vsel %vm400_vm2, %v2574_v1, 0.0 }
  0xea   :  { %v2156_v0 = vpop.f32.mrf.mxu0 }
  0xeb   :  { %v440_v2 = vsel %vm400_vm2, %v2571_v63, 0.0  ;;  %v2584_v7 = vadd.f32 %v2156_v0, %v2500_v19 }
  0xec   :  { %v303_v4 = vpop.f32.mrf.mxu0  ;;  %441 = vadd.xlane.f32.xlu1 %v440_v2  ;;  %444 = vadd.xlane.f32.xlu0 %v443_v3 }
  0xed   :  { %v2581_v5 = vadd.f32 %v2500_v19, %v303_v4  ;;  %v455_v15 = vsel %vm400_vm2, %v2584_v7, 0.0 }
  0xee   :  { %v2157_v6 = vpop.f32.mrf.mxu0 }
  0xef   :  { %3696 = vst [vmem:[#allocation12_spill] sm:$0xff] %v2581_v5  ;;  %v449_v9 = vsel %vm400_vm2, %v2581_v5, 0.0  ;;  %v2594_v13 = vadd.f32 %v2157_v6, %v2500_v19 }
  0xf0   :  { %v306_v10 = vpop.f32.mrf.mxu0  ;;  %447 = vadd.xlane.f32.xlu1 %v446_v8  ;;  %450 = vadd.xlane.f32.xlu0 %v449_v9 }
  0xf1   :  { %v2591_v11 = vadd.f32 %v2500_v19, %v306_v10  ;;  %3698 = vst [vmem:[#allocation14_spill] sm:$0xff] %v2594_v13  ;;  %v458_v22 = vsel %vm400_vm2, %v2594_v13, 0.0 }
  0xf2   :  { %v2160_v12 = vpop.f32.mrf.mxu0 }
  0xf3   :  { %3697 = vst [vmem:[#allocation13_spill] sm:$0xff] %v2591_v11  ;;  %v452_v14 = vsel %vm400_vm2, %v2591_v11, 0.0  ;;  %v2604_v20 = vadd.f32 %v2160_v12, %v2500_v19 }
  0xf4   :  { %v319_v16 = vpop.f32.mrf.mxu0  ;;  %453 = vadd.xlane.f32.xlu1 %v452_v14  ;;  %456 = vadd.xlane.f32.xlu0 %v455_v15 }
  0xf5   :  { %v2601_v17 = vadd.f32 %v2500_v19, %v319_v16  ;;  %v467_v32 = vsel %vm400_vm2, %v2604_v20, 0.0 }
  0xf6   :  { %v2161_v18 = vpop.f32.mrf.mxu0 }
  0xf7   :  { %v461_v24 = vsel %vm400_vm2, %v2601_v17, 0.0  ;;  %v2614_v30 = vadd.f32 %v2161_v18, %v2500_v19 }
  0xf8   :  { %v322_v25 = vpop.f32.mrf.mxu0  ;;  %459 = vadd.xlane.f32.xlu1 %v458_v22  ;;  %462 = vadd.xlane.f32.xlu0 %v461_v24 }
  0xf9   :  { %v2611_v27 = vadd.f32 %v2500_v19, %v322_v25  ;;  %3700 = vst [vmem:[#allocation16_spill] sm:$0xff] %v2614_v30  ;;  %v470_v40 = vsel %vm400_vm2, %v2614_v30, 0.0 }
  0xfa   :  { %v2164_v28 = vpop.f32.mrf.mxu0 }
  0xfb   :  { %3699 = vst [vmem:[#allocation15_spill] sm:$0xff] %v2611_v27  ;;  %v464_v31 = vsel %vm400_vm2, %v2611_v27, 0.0  ;;  %v2624_v38 = vadd.f32 %v2164_v28, %v2500_v19 }
  0xfc   :  { %v335_v33 = vpop.f32.mrf.mxu0  ;;  %465 = vadd.xlane.f32.xlu1 %v464_v31  ;;  %468 = vadd.xlane.f32.xlu0 %v467_v32 }
  0xfd   :  { %v2621_v35 = vadd.f32 %v2500_v19, %v335_v33  ;;  %v479_v50 = vsel %vm400_vm2, %v2624_v38, 0.0 }
  0xfe   :  { %v2165_v37 = vpop.f32.mrf.mxu0 }
  0xff   :  { %3701 = vst [vmem:[#allocation17_spill] sm:$0xff] %v2621_v35  ;;  %v473_v42 = vsel %vm400_vm2, %v2621_v35, 0.0  ;;  %v2634_v48 = vadd.f32 %v2165_v37, %v2500_v19 }
 0x100   :  { %v338_v43 = vpop.f32.mrf.mxu0  ;;  %471 = vadd.xlane.f32.xlu1 %v470_v40  ;;  %474 = vadd.xlane.f32.xlu0 %v473_v42 }
 0x101   :  { %v2631_v44 = vadd.f32 %v2500_v19, %v338_v43  ;;  %v482_v58 = vsel %vm400_vm2, %v2634_v48, 0.0 }
 0x102   :  { %v2168_v46 = vpop.f32.mrf.mxu0 }
 0x103   :  { %3702 = vst [vmem:[#allocation18_spill] sm:$0xff] %v2631_v44  ;;  %v476_v49 = vsel %vm400_vm2, %v2631_v44, 0.0  ;;  %v2641_v54 = vadd.f32 %v2168_v46, %v2500_v19 }
 0x104   :  { %v351_v52 = vpop.f32.mrf.mxu0  ;;  %477 = vadd.xlane.f32.xlu1 %v476_v49  ;;  %480 = vadd.xlane.f32.xlu0 %v479_v50 }
 0x105   :  { %v2644_v55 = vadd.f32 %v2500_v19, %v351_v52  ;;  %v491_v2 = vsel %vm400_vm2, %v2641_v54, 0.0 }
 0x106   :  { %v2169_v56 = vpop.f32.mrf.mxu0 }
 0x107   :  { %v485_v60 = vsel %vm400_vm2, %v2644_v55, 0.0  ;;  %v2651_v62 = vadd.f32 %v2169_v56, %v2500_v19 }
 0x108   :  { %v354_v61 = vpop.f32.mrf.mxu0  ;;  %483 = vadd.xlane.f32.xlu1 %v482_v58  ;;  %486 = vadd.xlane.f32.xlu0 %v485_v60 }
 0x109   :  { %v2654_v0 = vadd.f32 %v2500_v19, %v354_v61  ;;  %v494_v4 = vsel %vm400_vm2, %v2651_v62, 0.0 }
 0x10b   :  { %v488_v3 = vsel %vm400_vm2, %v2654_v0, 0.0 }
 0x10c   :  { %489 = vadd.xlane.f32.xlu1 %v488_v3  ;;  %492 = vadd.xlane.f32.xlu0 %v491_v2 }
 0x110   :  { %495 = vadd.xlane.f32.xlu1 %v494_v4 }
 0x157   :  { %v409_v6 = vpop.xlane.xlu1 %408 }
 0x158   :  { %v500_v8 = vmul.f32 0.015625, %v409_v6 }
 0x159   :  { %v403_v9 = vpop.xlane.xlu0 %402 }
 0x15a   :  { %v498_v10 = vmul.f32 0.015625, %v403_v9  ;;  %v2663_v19 = vsub.f32 %v2503_v21, %v500_v8 }
 0x15b   :  { %v412_v12 = vpop.xlane.xlu1 %411 }
 0x15c   :  { %v2666_v14 = vsub.f32 %v2506_v23, %v498_v10  ;;  %v501_v15 = vmul.f32 0.015625, %v412_v12  ;;  %v564_v31 = vmul.f32 %v2663_v19, %v2663_v19 }
 0x15d   :  { %v406_v16 = vpop.xlane.xlu0 %405 }
 0x15e   :  { %v499_v18 = vmul.f32 0.015625, %v406_v16  ;;  %v562_v22 = vmul.f32 %v2666_v14, %v2666_v14  ;;  %v2671_v24 = vsub.f32 %v2511_v26, %v501_v15  ;;  %v600_v42 = vsel %vm400_vm2, %v564_v31, 0.0 }
 0x160   :  { %v2674_v25 = vsub.f32 %v2516_v29, %v499_v18  ;;  %v594_v28 = vsel %vm400_vm2, %v562_v22, 0.0  ;;  %v565_v46 = vmul.f32 %v2671_v24, %v2671_v24 }
 0x161   :  { %595 = vadd.xlane.f32.xlu0 %v594_v28  ;;  %v415_v32 = vpop.xlane.xlu0 %414 }
 0x162   :  { %v502_v33 = vmul.f32 0.015625, %v415_v32  ;;  %v563_v37 = vmul.f32 %v2674_v25, %v2674_v25  ;;  %v603_v2 = vsel %vm400_vm2, %v565_v46, 0.0 }
 0x164   :  { %v2682_v40 = vsub.f32 %v2523_v34, %v502_v33  ;;  %v597_v43 = vsel %vm400_vm2, %v563_v37, 0.0 }
 0x165   :  { %v418_v49 = vpop.xlane.xlu1 %417  ;;  %601 = vadd.xlane.f32.xlu0 %v600_v42  ;;  %598 = vadd.xlane.f32.xlu1 %v597_v43  ;;  %v421_v50 = vpop.xlane.xlu0 %420 }
 0x166   :  { %v503_v52 = vmul.f32 0.015625, %v418_v49  ;;  %v504_v56 = vmul.f32 0.015625, %v421_v50  ;;  %v566_v58 = vmul.f32 %v2682_v40, %v2682_v40 }
 0x168   :  { %v2691_v60 = vsub.f32 %v2531_v39, %v503_v52  ;;  %v2694_v61 = vsub.f32 %v2526_v36, %v504_v56  ;;  %v606_v3 = vsel %vm400_vm2, %v566_v58, 0.0 }
 0x169   :  { %v424_v4 = vpop.xlane.xlu1 %423  ;;  %604 = vadd.xlane.f32.xlu1 %v603_v2  ;;  %607 = vadd.xlane.f32.xlu0 %v606_v3  ;;  %v427_v6 = vpop.xlane.xlu0 %426 }
 0x16a   :  { %v505_v8 = vmul.f32 0.015625, %v424_v4  ;;  %v506_v9 = vmul.f32 0.015625, %v427_v6  ;;  %v567_v10 = vmul.f32 %v2691_v60, %v2691_v60  ;;  %v568_v12 = vmul.f32 %v2694_v61, %v2694_v61 }
 0x16c   :  { %v2703_v15 = vsub.f32 %v2534_v41, %v505_v8  ;;  %v2706_v16 = vsub.f32 %v2541_v45, %v506_v9  ;;  %v609_v18 = vsel %vm400_vm2, %v567_v10, 0.0  ;;  %v612_v22 = vsel %vm400_vm2, %v568_v12, 0.0 }
 0x16d   :  { %v430_v28 = vpop.xlane.xlu1 %429  ;;  %610 = vadd.xlane.f32.xlu1 %v609_v18  ;;  %613 = vadd.xlane.f32.xlu0 %v612_v22  ;;  %v433_v31 = vpop.xlane.xlu0 %432 }
 0x16e   :  { %v507_v32 = vmul.f32 0.015625, %v430_v28  ;;  %v508_v33 = vmul.f32 0.015625, %v433_v31  ;;  %v569_v37 = vmul.f32 %v2703_v15, %v2703_v15  ;;  %v570_v42 = vmul.f32 %v2706_v16, %v2706_v16 }
 0x170   :  { %v2715_v43 = vsub.f32 %v2551_v51, %v507_v32  ;;  %v2718_v46 = vsub.f32 %v2544_v47, %v508_v33  ;;  %v615_v49 = vsel %vm400_vm2, %v569_v37, 0.0  ;;  %v618_v50 = vsel %vm400_vm2, %v570_v42, 0.0 }
 0x171   :  { %v436_v52 = vpop.xlane.xlu1 %435  ;;  %616 = vadd.xlane.f32.xlu1 %v615_v49  ;;  %619 = vadd.xlane.f32.xlu0 %v618_v50  ;;  %v439_v56 = vpop.xlane.xlu0 %438 }
 0x172   :  { %v509_v58 = vmul.f32 0.015625, %v436_v52  ;;  %v510_v2 = vmul.f32 0.015625, %v439_v56  ;;  %v571_v3 = vmul.f32 %v2715_v43, %v2715_v43  ;;  %v572_v4 = vmul.f32 %v2718_v46, %v2718_v46 }
 0x174   :  { %v2727_v6 = vsub.f32 %v2554_v53, %v509_v58  ;;  %v2730_v8 = vsub.f32 %v2561_v57, %v510_v2  ;;  %v621_v9 = vsel %vm400_vm2, %v571_v3, 0.0  ;;  %v624_v10 = vsel %vm400_vm2, %v572_v4, 0.0 }
 0x175   :  { %v442_v12 = vpop.xlane.xlu1 %441  ;;  %622 = vadd.xlane.f32.xlu1 %v621_v9  ;;  %625 = vadd.xlane.f32.xlu0 %v624_v10  ;;  %v445_v18 = vpop.xlane.xlu0 %444 }
 0x176   :  { %v511_v22 = vmul.f32 0.015625, %v442_v12  ;;  %v512_v28 = vmul.f32 0.015625, %v445_v18  ;;  %v573_v31 = vmul.f32 %v2727_v6, %v2727_v6  ;;  %v574_v32 = vmul.f32 %v2730_v8, %v2730_v8 }
 0x178   :  { %v2739_v33 = vsub.f32 %v2571_v63, %v511_v22  ;;  %v2742_v37 = vsub.f32 %v2564_v59, %v512_v28  ;;  %v627_v42 = vsel %vm400_vm2, %v573_v31, 0.0  ;;  %v630_v49 = vsel %vm400_vm2, %v574_v32, 0.0 }
 0x179   :  { %v448_v50 = vpop.xlane.xlu1 %447  ;;  %628 = vadd.xlane.f32.xlu1 %v627_v42  ;;  %631 = vadd.xlane.f32.xlu0 %v630_v49  ;;  %v451_v52 = vpop.xlane.xlu0 %450  ;;  %v2240_v49 = vld [vmem:[%s3656_s2 + $0x18] sm:$0xff]  }
 0x17a   :  { %v513_v56 = vmul.f32 0.015625, %v448_v50  ;;  %v514_v58 = vmul.f32 0.015625, %v451_v52  ;;  %v575_v2 = vmul.f32 %v2739_v33, %v2739_v33  ;;  %v576_v3 = vmul.f32 %v2742_v37, %v2742_v37  ;;  %2170 = vmatprep.subr.bf16.mxu1 %v2240_v49 }
 0x17b   :  { %2171 = vmatpush3.bf16.msra.mxu1 %v2240_v49 }
 0x17c   :  { %v2751_v4 = vsub.f32 %v2574_v1, %v513_v56  ;;  %v2754_v9 = vsub.f32 %v2581_v5, %v514_v58  ;;  %v633_v10 = vsel %vm400_vm2, %v575_v2, 0.0  ;;  %v636_v12 = vsel %vm400_vm2, %v576_v3, 0.0 }
 0x17d   :  { %v454_v18 = vpop.xlane.xlu1 %453  ;;  %634 = vadd.xlane.f32.xlu1 %v633_v10  ;;  %637 = vadd.xlane.f32.xlu0 %v636_v12  ;;  %v457_v22 = vpop.xlane.xlu0 %456 }
 0x17e   :  { %v515_v28 = vmul.f32 0.015625, %v454_v18  ;;  %v516_v31 = vmul.f32 0.015625, %v457_v22  ;;  %v577_v32 = vmul.f32 %v2751_v4, %v2751_v4  ;;  %v578_v42 = vmul.f32 %v2754_v9, %v2754_v9 }
 0x180   :  { %v2766_v50 = vsub.f32 %v2591_v11, %v515_v28  ;;  %v2769_v52 = vsub.f32 %v2584_v7, %v516_v31  ;;  %v639_v56 = vsel %vm400_vm2, %v577_v32, 0.0  ;;  %v642_v58 = vsel %vm400_vm2, %v578_v42, 0.0  ;;  %v2241_v28 = vld [vmem:[%s3656_s2 + $0x10] sm:$0xff]  }
 0x181   :  { %v460_v2 = vpop.xlane.xlu1 %459  ;;  %640 = vadd.xlane.f32.xlu1 %v639_v56  ;;  %643 = vadd.xlane.f32.xlu0 %v642_v58  ;;  %v463_v3 = vpop.xlane.xlu0 %462 }
 0x182   :  { %v517_v10 = vmul.f32 0.015625, %v460_v2  ;;  %v518_v12 = vmul.f32 0.015625, %v463_v3  ;;  %v579_v18 = vmul.f32 %v2766_v50, %v2766_v50  ;;  %v580_v22 = vmul.f32 %v2769_v52, %v2769_v52  ;;  %2172 = vmatprep.subr.bf16.mxu1 %v2241_v28 }
 0x183   :  { %2173 = vmatpush3.bf16.msra.mxu1 %v2241_v28 }
 0x184   :  { %v2781_v31 = vsub.f32 %v2594_v13, %v517_v10  ;;  %v2784_v32 = vsub.f32 %v2601_v17, %v518_v12  ;;  %v645_v42 = vsel %vm400_vm2, %v579_v18, 0.0  ;;  %v648_v56 = vsel %vm400_vm2, %v580_v22, 0.0  ;;  %v2242_v12 = vld [vmem:[%s3656_s2 + $0x8] sm:$0xff]  }
 0x185   :  { %v466_v58 = vpop.xlane.xlu1 %465  ;;  %646 = vadd.xlane.f32.xlu1 %v645_v42  ;;  %649 = vadd.xlane.f32.xlu0 %v648_v56  ;;  %v469_v2 = vpop.xlane.xlu0 %468 }
 0x186   :  { %v519_v49 = vmul.f32 0.015625, %v466_v58  ;;  %v520_v3 = vmul.f32 0.015625, %v469_v2  ;;  %v581_v11 = vmul.f32 %v2781_v31, %v2781_v31  ;;  %v582_v10 = vmul.f32 %v2784_v32, %v2784_v32  ;;  %2174 = vmatprep.subr.bf16.mxu1 %v2242_v12 }
 0x187   :  { %2175 = vmatpush3.bf16.msra.mxu1 %v2242_v12 }
 0x188   :  { %v2796_v18 = vsub.f32 %v2611_v27, %v519_v49  ;;  %v2799_v22 = vsub.f32 %v2604_v20, %v520_v3  ;;  %v651_v42 = vsel %vm400_vm2, %v581_v11, 0.0  ;;  %v654_v56 = vsel %vm400_vm2, %v582_v10, 0.0  ;;  %v2243_v11 = vld [vmem:[%s3656_s2] sm:$0xff]   ;;  %s2394_s2 = smov 64  }
 0x189   :  { %v472_v58 = vpop.xlane.xlu1 %471  ;;  %652 = vadd.xlane.f32.xlu1 %v651_v42  ;;  %655 = vadd.xlane.f32.xlu0 %v654_v56  ;;  %v475_v2 = vpop.xlane.xlu0 %474 }
 0x18a   :  { %v521_v28 = vmul.f32 0.015625, %v472_v58  ;;  %v522_v29 = vmul.f32 0.015625, %v475_v2  ;;  %v583_v13 = vmul.f32 %v2796_v18, %v2796_v18  ;;  %v584_v49 = vmul.f32 %v2799_v22, %v2799_v22  ;;  %2176 = vmatprep.subr.bf16.mxu1 %v2243_v11 }
 0x18b   :  { %2177 = vmatpush3.bf16.msra.mxu1 %v2243_v11 }
 0x18c   :  { %v2811_v3 = vsub.f32 %v2614_v30, %v521_v28  ;;  %v2814_v10 = vsub.f32 %v2621_v35, %v522_v29  ;;  %v657_v42 = vsel %vm400_vm2, %v583_v13, 0.0  ;;  %v660_v56 = vsel %vm400_vm2, %v584_v49, 0.0 }
 0x18d   :  { %v478_v58 = vpop.xlane.xlu1 %477  ;;  %658 = vadd.xlane.f32.xlu1 %v657_v42  ;;  %661 = vadd.xlane.f32.xlu0 %v660_v56  ;;  %v481_v2 = vpop.xlane.xlu0 %480 }
 0x18e   :  { %v523_v12 = vmul.f32 0.015625, %v478_v58  ;;  %v524_v26 = vmul.f32 0.015625, %v481_v2  ;;  %v585_v27 = vmul.f32 %v2811_v3, %v2811_v3  ;;  %v586_v28 = vmul.f32 %v2814_v10, %v2814_v10 }
 0x190   :  { %v2823_v29 = vsub.f32 %v2631_v44, %v523_v12  ;;  %v2826_v13 = vsub.f32 %v2624_v38, %v524_v26  ;;  %v663_v49 = vsel %vm400_vm2, %v585_v27, 0.0  ;;  %v666_v42 = vsel %vm400_vm2, %v586_v28, 0.0 }
 0x191   :  { %v484_v56 = vpop.xlane.xlu1 %483  ;;  %664 = vadd.xlane.f32.xlu1 %v663_v49  ;;  %667 = vadd.xlane.f32.xlu0 %v666_v42  ;;  %v487_v58 = vpop.xlane.xlu0 %486 }
 0x192   :  { %v525_v2 = vmul.f32 0.015625, %v484_v56  ;;  %v526_v39 = vmul.f32 0.015625, %v487_v58  ;;  %v587_v30 = vmul.f32 %v2823_v29, %v2823_v29  ;;  %v588_v11 = vmul.f32 %v2826_v13, %v2826_v13 }
 0x194   :  { %v2835_v12 = vsub.f32 %v2634_v48, %v525_v2  ;;  %v2838_v26 = vsub.f32 %v2644_v55, %v526_v39  ;;  %v669_v27 = vsel %vm400_vm2, %v587_v30, 0.0  ;;  %v672_v28 = vsel %vm400_vm2, %v588_v11, 0.0 }
 0x195   :  { %v490_v49 = vpop.xlane.xlu1 %489  ;;  %670 = vadd.xlane.f32.xlu1 %v669_v27  ;;  %673 = vadd.xlane.f32.xlu0 %v672_v28  ;;  %v493_v42 = vpop.xlane.xlu0 %492 }
 0x196   :  { %v527_v56 = vmul.f32 0.015625, %v490_v49  ;;  %v528_v58 = vmul.f32 0.015625, %v493_v42  ;;  %v589_v41 = vmul.f32 %v2835_v12, %v2835_v12  ;;  %v590_v2 = vmul.f32 %v2838_v26, %v2838_v26 }
 0x198   :  { %v2847_v44 = vsub.f32 %v2654_v0, %v527_v56  ;;  %v2850_v39 = vsub.f32 %v2641_v54, %v528_v58  ;;  %v675_v30 = vsel %vm400_vm2, %v589_v41, 0.0  ;;  %v678_v11 = vsel %vm400_vm2, %v590_v2, 0.0 }
 0x199   :  { %v496_v27 = vpop.xlane.xlu1 %495  ;;  %676 = vadd.xlane.f32.xlu1 %v675_v30  ;;  %679 = vadd.xlane.f32.xlu0 %v678_v11  ;;  %v381_v30 = vmax.f32 %v2574_v1, 0.0  ;;  %v380_v11 = vmax.f32 %v2564_v59, 0.0  ;;  %v379_v1 = vmax.f32 %v2571_v63, 0.0  ;;  %v394_v59 = vmax.f32 %v2644_v55, 0.0 }
 0x19a   :  { %v529_v28 = vmul.f32 0.015625, %v496_v27  ;;  %v591_v49 = vmul.f32 %v2847_v44, %v2847_v44  ;;  %v592_v42 = vmul.f32 %v2850_v39, %v2850_v39  ;;  %v396_v27 = vmax.f32 %v2641_v54, 0.0 }
 0x19b   :  { %v395_v54 = vmax.f32 %v2654_v0, 0.0 }
 0x19c   :  { %v2859_v56 = vsub.f32 %v2651_v62, %v529_v28  ;;  %v681_v58 = vsel %vm400_vm2, %v591_v49, 0.0  ;;  %v684_v35 = vsel %vm400_vm2, %v592_v42, 0.0  ;;  %v378_v28 = vmax.f32 %v2561_v57, 0.0 }
 0x19d   :  { %682 = vadd.xlane.f32.xlu1 %v681_v58  ;;  %685 = vadd.xlane.f32.xlu0 %v684_v35  ;;  %v397_v35 = vmax.f32 %v2651_v62, 0.0 }
 0x19e   :  { %v593_v41 = vmul.f32 %v2859_v56, %v2859_v56 }
 0x1a0   :  { %v687_v2 = vsel %vm400_vm2, %v593_v41, 0.0 }
 0x1a1   :  { %688 = vadd.xlane.f32.xlu1 %v687_v2 }
 0x1b2   :  { %1738 = vrot.lane.b32.xlu1 %v381_v30, %s2394_s2 }
 0x1b3   :  { %1736 = vrot.lane.b32.xlu0 %v380_v11, %s2394_s2 }
 0x1b6   :  { %1768 = vrot.lane.b32.xlu1 %v396_v27, %s2394_s2 }
 0x1b7   :  { %1732 = vrot.lane.b32.xlu0 %v378_v28, %s2394_s2 }
 0x1ba   :  { %1770 = vrot.lane.b32.xlu1 %v397_v35, %s2394_s2 }
 0x1be   :  { %1734 = vrot.lane.b32.xlu1 %v379_v1, %s2394_s2 }
 0x1c2   :  { %1764 = vrot.lane.b32.xlu1 %v394_v59, %s2394_s2 }
 0x1c6   :  { %1766 = vrot.lane.b32.xlu1 %v395_v54, %s2394_s2 }
 0x1ea   :  { %v596_v57 = vpop.xlane.xlu0 %595 }
 0x1eb   :  { %v690_v49 = vmul.f32 0.015625, %v596_v57 }
 0x1ed   :  { %v722_v42 = vadd.f32 1e-05, %v690_v49 }
 0x1ee   :  { %v599_v58 = vpop.xlane.xlu1 %598  ;;  %v602_v41 = vpop.xlane.xlu0 %601 }
 0x1ef   :  { %2244 = vrsqrt.f32 %v722_v42  ;;  %v691_v62 = vmul.f32 0.015625, %v599_v58  ;;  %v692_v2 = vmul.f32 0.015625, %v602_v41 }
 0x1f1   :  { %v723_v30 = vadd.f32 1e-05, %v691_v62  ;;  %v724_v63 = vadd.f32 1e-05, %v692_v2 }
 0x1f2   :  { %v605_v11 = vpop.xlane.xlu1 %604  ;;  %v608_v27 = vpop.xlane.xlu0 %607 }
 0x1f3   :  { %2246 = vrsqrt.f32 %v723_v30  ;;  %v693_v55 = vmul.f32 0.015625, %v605_v11  ;;  %v694_v28 = vmul.f32 0.015625, %v608_v27  ;;  %v2885_v30 = vld [vmem:[%s3657_s3 + $0x1] ss:$0 sm:$0xff] }
 0x1f4   :  { %2248 = vrsqrt.f32 %v724_v63 }
 0x1f5   :  { %v725_v35 = vadd.f32 1e-05, %v693_v55  ;;  %v726_v0 = vadd.f32 1e-05, %v694_v28 }
 0x1f6   :  { %v611_v1 = vpop.xlane.xlu1 %610  ;;  %v614_v59 = vpop.xlane.xlu0 %613 }
 0x1f7   :  { %2250 = vrsqrt.f32 %v725_v35  ;;  %v695_v54 = vmul.f32 0.015625, %v611_v1  ;;  %v696_v57 = vmul.f32 0.015625, %v614_v59  ;;  %v2891_v1 = vld [vmem:[%s3657_s3 + $0x2] ss:$0 sm:$0xff] }
 0x1f8   :  { %2252 = vrsqrt.f32 %v726_v0 }
 0x1f9   :  { %v727_v49 = vadd.f32 1e-05, %v695_v54  ;;  %v728_v42 = vadd.f32 1e-05, %v696_v57 }
 0x1fa   :  { %v617_v58 = vpop.xlane.xlu1 %616  ;;  %v620_v41 = vpop.xlane.xlu0 %619 }
 0x1fb   :  { %2254 = vrsqrt.f32 %v727_v49  ;;  %v697_v62 = vmul.f32 0.015625, %v617_v58  ;;  %v698_v2 = vmul.f32 0.015625, %v620_v41 }
 0x1fc   :  { %v2245_v51 = vpop.eup %2244  ;;  %2256 = vrsqrt.f32 %v728_v42 }
 0x1fd   :  { %v729_v63 = vadd.f32 1e-05, %v697_v62  ;;  %v730_v11 = vadd.f32 1e-05, %v698_v2  ;;  %v786_v27 = vmul.f32 %v2245_v51, %v2666_v14 }
 0x1fe   :  { %v623_v55 = vpop.xlane.xlu1 %622  ;;  %v626_v28 = vpop.xlane.xlu0 %625 }
 0x1ff   :  { %2258 = vrsqrt.f32 %v729_v63  ;;  %v699_v35 = vmul.f32 0.015625, %v623_v55  ;;  %v700_v0 = vmul.f32 0.015625, %v626_v28  ;;  %v822_v59 = vmul.f32 %v2885_v30, %v786_v27 }
 0x200   :  { %v2247_v54 = vpop.eup %2246  ;;  %2260 = vrsqrt.f32 %v730_v11 }
 0x201   :  { %v2249_v57 = vpop.eup %2248  ;;  %v731_v49 = vadd.f32 1e-05, %v699_v35  ;;  %v732_v42 = vadd.f32 1e-05, %v700_v0  ;;  %v787_v58 = vmul.f32 %v2247_v54, %v2674_v25  ;;  %v858_v41 = vadd.f32 %v2891_v1, %v822_v59 }
 0x202   :  { %v629_v51 = vpop.xlane.xlu1 %628  ;;  %v632_v14 = vpop.xlane.xlu0 %631  ;;  %v788_v62 = vmul.f32 %v2249_v57, %v2663_v19 }
 0x203   :  { %2262 = vrsqrt.f32 %v731_v49  ;;  %v701_v2 = vmul.f32 0.015625, %v629_v51  ;;  %v702_v63 = vmul.f32 0.015625, %v632_v14  ;;  %v823_v55 = vmul.f32 %v2885_v30, %v787_v58 }
 0x204   :  { %v2251_v28 = vpop.eup %2250  ;;  %2264 = vrsqrt.f32 %v732_v42  ;;  %v824_v11 = vmul.f32 %v2885_v30, %v788_v62  ;;  %v890_v23 = vmax.f32 %v858_v41, 0.0 }
 0x205   :  { %v2253_v27 = vpop.eup %2252  ;;  %v733_v35 = vadd.f32 1e-05, %v701_v2  ;;  %v734_v0 = vadd.f32 1e-05, %v702_v63  ;;  %v859_v25 = vadd.f32 %v2891_v1, %v823_v55  ;;  %v789_v54 = vmul.f32 %v2251_v28, %v2671_v24 }
 0x206   :  { %v635_v5 = vpop.xlane.xlu1 %634  ;;  %v638_v59 = vpop.xlane.xlu0 %637  ;;  %v790_v19 = vmul.f32 %v2253_v27, %v2682_v40  ;;  %v860_v14 = vadd.f32 %v2891_v1, %v824_v11 }
 0x207   :  { %2266 = vrsqrt.f32 %v733_v35  ;;  %v703_v57 = vmul.f32 0.015625, %v635_v5  ;;  %v704_v49 = vmul.f32 0.015625, %v638_v59  ;;  %v891_v58 = vmax.f32 %v859_v25, 0.0 }
 0x208   :  { %v2255_v51 = vpop.eup %2254  ;;  %2268 = vrsqrt.f32 %v734_v0  ;;  %v825_v42 = vmul.f32 %v2885_v30, %v789_v54  ;;  %v826_v62 = vmul.f32 %v2885_v30, %v790_v19 }
 0x209   :  { %v2257_v2 = vpop.eup %2256  ;;  %v735_v63 = vadd.f32 1e-05, %v703_v57  ;;  %v736_v24 = vadd.f32 1e-05, %v704_v49  ;;  %v922_v55 = vpack.c.bf16 %v891_v58, %v890_v23  ;;  %v791_v41 = vmul.f32 %v2255_v51, %v2691_v60 }
 0x20a   :  { %v641_v28 = vpop.xlane.xlu1 %640  ;;  %v644_v40 = vpop.xlane.xlu0 %643  ;;  %v861_v5 = vadd.f32 %v2891_v1, %v825_v42  ;;  %v862_v27 = vadd.f32 %v2891_v1, %v826_v62  ;;  %v792_v35 = vmul.f32 %v2257_v2, %v2694_v61  ;;  %v892_v23 = vmax.f32 %v860_v14, 0.0 }
 0x20b   :  { %2270 = vrsqrt.f32 %v735_v63  ;;  %v705_v0 = vmul.f32 0.015625, %v641_v28  ;;  %v706_v25 = vmul.f32 0.015625, %v644_v40  ;;  %2178 = vmatprep.mubr.msk.bf16.mxu1 %vm400_vm2, %v922_v55  ;;  %v827_v11 = vmul.f32 %v2885_v30, %v791_v41 }
 0x20c   :  { %v2259_v54 = vpop.eup %2258  ;;  %2272 = vrsqrt.f32 %v736_v24  ;;  %v893_v59 = vmax.f32 %v861_v5, 0.0  ;;  %v828_v60 = vmul.f32 %v2885_v30, %v792_v35  ;;  %v894_v2 = vmax.f32 %v862_v27, 0.0 }
 0x20d   :  { %v2261_v19 = vpop.eup %2260  ;;  %v737_v57 = vadd.f32 1e-05, %v705_v0  ;;  %v738_v49 = vadd.f32 1e-05, %v706_v25  ;;  %v863_v58 = vadd.f32 %v2891_v1, %v827_v11  ;;  %v793_v61 = vmul.f32 %v2259_v54, %v2703_v15 }
 0x20e   :  { %v647_v51 = vpop.xlane.xlu1 %646  ;;  %v650_v42 = vpop.xlane.xlu0 %649  ;;  %v923_v62 = vpack.c.bf16 %v893_v59, %v892_v23  ;;  %v794_v63 = vmul.f32 %v2261_v19, %v2706_v16  ;;  %v864_v40 = vadd.f32 %v2891_v1, %v828_v60 }
 0x20f   :  { %2274 = vrsqrt.f32 %v737_v57  ;;  %v707_v55 = vmul.f32 0.015625, %v647_v51  ;;  %v708_v24 = vmul.f32 0.015625, %v650_v42  ;;  %v895_v14 = vmax.f32 %v863_v58, 0.0 }
 0x210   :  { %v2263_v41 = vpop.eup %2262  ;;  %2276 = vrsqrt.f32 %v738_v49  ;;  %2179 = vmatmul.mubr.msk.bf16.vlgmr.msra.gmra.mxu1 %vm400_vm2, %v923_v62  ;;  %v829_v28 = vmul.f32 %v2885_v30, %v793_v61  ;;  %v830_v15 = vmul.f32 %v2885_v30, %v794_v63  ;;  %v896_v58 = vmax.f32 %v864_v40, 0.0 }
 0x211   :  { %v2265_v5 = vpop.eup %2264  ;;  %v739_v35 = vadd.f32 1e-05, %v707_v55  ;;  %v740_v0 = vadd.f32 1e-05, %v708_v24  ;;  %v924_v27 = vpack.c.bf16 %v895_v14, %v894_v2  ;;  %v795_v16 = vmul.f32 %v2263_v41, %v2715_v43 }
 0x212   :  { %v653_v25 = vpop.xlane.xlu1 %652  ;;  %v656_v11 = vpop.xlane.xlu0 %655  ;;  %v865_v54 = vadd.f32 %v2891_v1, %v829_v28  ;;  %v866_v23 = vadd.f32 %v2891_v1, %v830_v15  ;;  %v796_v59 = vmul.f32 %v2265_v5, %v2718_v46 }
 0x213   :  { %2278 = vrsqrt.f32 %v739_v35  ;;  %v709_v19 = vmul.f32 0.015625, %v653_v25  ;;  %v710_v57 = vmul.f32 0.015625, %v656_v11  ;;  %2182 = vmatprep.mubr.msk.bf16.mxu1 %vm400_vm2, %v924_v27  ;;  %v831_v60 = vmul.f32 %v2885_v30, %v795_v16 }
 0x214   :  { %v2267_v49 = vpop.eup %2266  ;;  %2280 = vrsqrt.f32 %v740_v0  ;;  %v897_v61 = vmax.f32 %v865_v54, 0.0  ;;  %v832_v43 = vmul.f32 %v2885_v30, %v796_v59  ;;  %v898_v14 = vmax.f32 %v866_v23, 0.0 }
 0x215   :  { %v2269_v51 = vpop.eup %2268  ;;  %v741_v42 = vadd.f32 1e-05, %v709_v19  ;;  %v742_v62 = vadd.f32 1e-05, %v710_v57  ;;  %v867_v2 = vadd.f32 %v2891_v1, %v831_v60  ;;  %v797_v46 = vmul.f32 %v2267_v49, %v2727_v6 }
 0x216   :  { %v659_v63 = vpop.xlane.xlu1 %658  ;;  %v662_v55 = vpop.xlane.xlu0 %661  ;;  %v925_v24 = vpack.c.bf16 %v897_v61, %v896_v58  ;;  %v798_v41 = vmul.f32 %v2269_v51, %v2730_v8  ;;  %v868_v0 = vadd.f32 %v2891_v1, %v832_v43 }
 0x217   :  { %2282 = vrsqrt.f32 %v741_v42  ;;  %v711_v28 = vmul.f32 0.015625, %v659_v63  ;;  %v712_v15 = vmul.f32 0.015625, %v662_v55  ;;  %v899_v40 = vmax.f32 %v867_v2, 0.0 }
 0x218   :  { %v2271_v5 = vpop.eup %2270  ;;  %2284 = vrsqrt.f32 %v742_v62  ;;  %2183 = vmatmul.mubr.msk.bf16.gmra.mxu1 %vm400_vm2, %v925_v24  ;;  %v833_v35 = vmul.f32 %v2885_v30, %v797_v46  ;;  %v834_v6 = vmul.f32 %v2885_v30, %v798_v41  ;;  %v900_v43 = vmax.f32 %v868_v0, 0.0 }
 0x219   :  { %v2273_v27 = vpop.eup %2272  ;;  %v743_v16 = vadd.f32 1e-05, %v711_v28  ;;  %v744_v25 = vadd.f32 1e-05, %v712_v15  ;;  %v926_v11 = vpack.c.bf16 %v899_v40, %v898_v14  ;;  %v799_v8 = vmul.f32 %v2271_v5, %v2739_v33 }
 0x21a   :  { %v665_v54 = vpop.xlane.xlu1 %664  ;;  %v668_v23 = vpop.xlane.xlu0 %667  ;;  %v869_v59 = vadd.f32 %v2891_v1, %v833_v35  ;;  %v870_v19 = vadd.f32 %v2891_v1, %v834_v6  ;;  %v800_v57 = vmul.f32 %v2273_v27, %v2742_v37 }
 0x21b   :  { %2286 = vrsqrt.f32 %v743_v16  ;;  %v713_v60 = vmul.f32 0.015625, %v665_v54  ;;  %v714_v49 = vmul.f32 0.015625, %v668_v23  ;;  %2186 = vmatprep.mubr.msk.bf16.mxu1 %vm400_vm2, %v926_v11  ;;  %v835_v58 = vmul.f32 %v2885_v30, %v799_v8 }
 0x21c   :  { %v2275_v61 = vpop.eup %2274  ;;  %2288 = vrsqrt.f32 %v744_v25  ;;  %v901_v51 = vmax.f32 %v869_v59, 0.0  ;;  %v836_v33 = vmul.f32 %v2885_v30, %v800_v57  ;;  %v902_v14 = vmax.f32 %v870_v19, 0.0 }
 0x21d   :  { %v2277_v42 = vpop.eup %2276  ;;  %v745_v62 = vadd.f32 1e-05, %v713_v60  ;;  %v746_v2 = vadd.f32 1e-05, %v714_v49  ;;  %v871_v46 = vadd.f32 %v2891_v1, %v835_v58  ;;  %v801_v37 = vmul.f32 %v2275_v61, %v2751_v4 }
 0x21e   :  { %v671_v63 = vpop.xlane.xlu1 %670  ;;  %v674_v55 = vpop.xlane.xlu0 %673  ;;  %v927_v24 = vpack.c.bf16 %v901_v51, %v900_v43  ;;  %v802_v41 = vmul.f32 %v2277_v42, %v2754_v9  ;;  %v872_v0 = vadd.f32 %v2891_v1, %v836_v33 }
 0x21f   :  { %2290 = vrsqrt.f32 %v745_v62  ;;  %v715_v28 = vmul.f32 0.015625, %v671_v63  ;;  %v716_v15 = vmul.f32 0.015625, %v674_v55  ;;  %v903_v40 = vmax.f32 %v871_v46, 0.0 }
 0x220   :  { %v2279_v5 = vpop.eup %2278  ;;  %2292 = vrsqrt.f32 %v746_v2  ;;  %2187 = vmatmul.mubr.msk.bf16.gmra.mxu1 %vm400_vm2, %v927_v24  ;;  %v837_v35 = vmul.f32 %v2885_v30, %v801_v37  ;;  %v838_v4 = vmul.f32 %v2885_v30, %v802_v41  ;;  %v904_v58 = vmax.f32 %v872_v0, 0.0 }
 0x221   :  { %v2281_v6 = vpop.eup %2280  ;;  %v747_v27 = vadd.f32 1e-05, %v715_v28  ;;  %v748_v16 = vadd.f32 1e-05, %v716_v15  ;;  %v928_v25 = vpack.c.bf16 %v903_v40, %v902_v14  ;;  %v803_v9 = vmul.f32 %v2279_v5, %v2766_v50 }
 0x222   :  { %v677_v11 = vpop.xlane.xlu1 %676  ;;  %v680_v8 = vpop.xlane.xlu0 %679  ;;  %v873_v54 = vadd.f32 %v2891_v1, %v837_v35  ;;  %v874_v23 = vadd.f32 %v2891_v1, %v838_v4  ;;  %v804_v59 = vmul.f32 %v2281_v6, %v2769_v52 }
 0x223   :  { %2294 = vrsqrt.f32 %v747_v27  ;;  %v717_v19 = vmul.f32 0.015625, %v677_v11  ;;  %v718_v57 = vmul.f32 0.015625, %v680_v8  ;;  %2190 = vmatprep.mubr.msk.bf16.mxu1 %vm400_vm2, %v928_v25  ;;  %v839_v60 = vmul.f32 %v2885_v30, %v803_v9 }
 0x224   :  { %v2283_v49 = vpop.eup %2282  ;;  %2296 = vrsqrt.f32 %v748_v16  ;;  %v905_v61 = vmax.f32 %v873_v54, 0.0  ;;  %v840_v50 = vmul.f32 %v2885_v30, %v804_v59  ;;  %v906_v37 = vmax.f32 %v874_v23, 0.0 }
 0x225   :  { %v2285_v43 = vpop.eup %2284  ;;  %v749_v51 = vadd.f32 1e-05, %v717_v19  ;;  %v750_v33 = vadd.f32 1e-05, %v718_v57  ;;  %v875_v42 = vadd.f32 %v2891_v1, %v839_v60  ;;  %v805_v52 = vmul.f32 %v2283_v49, %v2781_v31 }
 0x226   :  { %v683_v62 = vpop.xlane.xlu1 %682  ;;  %v686_v2 = vpop.xlane.xlu0 %685  ;;  %v929_v46 = vpack.c.bf16 %v905_v61, %v904_v58  ;;  %v806_v63 = vmul.f32 %v2285_v43, %v2784_v32  ;;  %v876_v15 = vadd.f32 %v2891_v1, %v840_v50 }
 0x227   :  { %2298 = vrsqrt.f32 %v749_v51  ;;  %v719_v55 = vmul.f32 0.015625, %v683_v62  ;;  %v720_v24 = vmul.f32 0.015625, %v686_v2  ;;  %v907_v14 = vmax.f32 %v875_v42, 0.0 }
 0x228   :  { %v2287_v41 = vpop.eup %2286  ;;  %2300 = vrsqrt.f32 %v750_v33  ;;  %2191 = vmatmul.mubr.msk.bf16.gmra.mxu1 %vm400_vm2, %v929_v46  ;;  %v841_v28 = vmul.f32 %v2885_v30, %v805_v52  ;;  %v842_v31 = vmul.f32 %v2885_v30, %v806_v63  ;;  %v908_v8 = vmax.f32 %v876_v15, 0.0 }
 0x229   :  { %v2289_v40 = vpop.eup %2288  ;;  %v751_v5 = vadd.f32 1e-05, %v719_v55  ;;  %v752_v35 = vadd.f32 1e-05, %v720_v24  ;;  %v930_v0 = vpack.c.bf16 %v907_v14, %v906_v37  ;;  %v807_v32 = vmul.f32 %v2287_v41, %v2796_v18 }
 0x22a   :  { %v689_v4 = vpop.xlane.xlu1 %688  ;;  %v877_v6 = vadd.f32 %v2891_v1, %v841_v28  ;;  %v878_v27 = vadd.f32 %v2891_v1, %v842_v31  ;;  %v808_v16 = vmul.f32 %v2289_v40, %v2799_v22 }
 0x22b   :  { %2302 = vrsqrt.f32 %v751_v5  ;;  %v721_v25 = vmul.f32 0.015625, %v689_v4  ;;  %2194 = vmatprep.mubr.msk.bf16.mxu1 %vm400_vm2, %v930_v0  ;;  %v843_v9 = vmul.f32 %v2885_v30, %v807_v32 }
 0x22c   :  { %v2291_v11 = vpop.eup %2290  ;;  %2304 = vrsqrt.f32 %v752_v35  ;;  %v909_v54 = vmax.f32 %v877_v6, 0.0  ;;  %v844_v23 = vmul.f32 %v2885_v30, %v808_v16  ;;  %v910_v22 = vmax.f32 %v878_v27, 0.0 }
 0x22d   :  { %v2293_v18 = vpop.eup %2292  ;;  %v753_v59 = vadd.f32 1e-05, %v721_v25  ;;  %v879_v19 = vadd.f32 %v2891_v1, %v843_v9  ;;  %v809_v57 = vmul.f32 %v2291_v11, %v2811_v3 }
 0x22e   :  { %v931_v60 = vpack.c.bf16 %v909_v54, %v908_v8  ;;  %v810_v49 = vmul.f32 %v2293_v18, %v2814_v10  ;;  %v880_v50 = vadd.f32 %v2891_v1, %v844_v23 }
 0x22f   :  { %2306 = vrsqrt.f32 %v753_v59  ;;  %v911_v58 = vmax.f32 %v879_v19, 0.0  ;;  %v845_v61 = vmul.f32 %v2885_v30, %v809_v57 }
 0x230   :  { %v2295_v43 = vpop.eup %2294  ;;  %2195 = vmatmul.mubr.msk.bf16.gmra.mxu1 %vm400_vm2, %v931_v60  ;;  %v846_v51 = vmul.f32 %v2885_v30, %v810_v49  ;;  %v912_v10 = vmax.f32 %v880_v50, 0.0 }
 0x231   :  { %v2297_v33 = vpop.eup %2296  ;;  %v932_v42 = vpack.c.bf16 %v911_v58, %v910_v22  ;;  %v881_v52 = vadd.f32 %v2891_v1, %v845_v61  ;;  %v811_v3 = vmul.f32 %v2295_v43, %v2823_v29 }
 0x232   :  { %v812_v62 = vmul.f32 %v2297_v33, %v2826_v13  ;;  %v882_v37 = vadd.f32 %v2891_v1, %v846_v51 }
 0x233   :  { %2198 = vmatprep.mubr.msk.bf16.mxu1 %vm400_vm2, %v932_v42  ;;  %v913_v2 = vmax.f32 %v881_v52, 0.0  ;;  %v847_v46 = vmul.f32 %v2885_v30, %v811_v3 }
 0x234   :  { %v2299_v63 = vpop.eup %2298  ;;  %v848_v55 = vmul.f32 %v2885_v30, %v812_v62  ;;  %v914_v13 = vmax.f32 %v882_v37, 0.0 }
 0x235   :  { %v2301_v24 = vpop.eup %2300  ;;  %v933_v14 = vpack.c.bf16 %v913_v2, %v912_v10  ;;  %v883_v41 = vadd.f32 %v2891_v1, %v847_v46  ;;  %v813_v28 = vmul.f32 %v2299_v63, %v2835_v12 }
 0x236   :  { %v814_v29 = vmul.f32 %v2301_v24, %v2838_v26  ;;  %v884_v40 = vadd.f32 %v2891_v1, %v848_v55 }
 0x237   :  { %v915_v15 = vmax.f32 %v883_v41, 0.0  ;;  %v849_v31 = vmul.f32 %v2885_v30, %v813_v28 }
 0x238   :  { %v2303_v5 = vpop.eup %2302  ;;  %2199 = vmatmul.mubr.msk.bf16.gmra.mxu1 %vm400_vm2, %v933_v14  ;;  %v850_v35 = vmul.f32 %v2885_v30, %v814_v29  ;;  %v916_v26 = vmax.f32 %v884_v40, 0.0 }
 0x239   :  { %v2305_v0 = vpop.eup %2304  ;;  %v934_v32 = vpack.c.bf16 %v915_v15, %v914_v13  ;;  %v885_v4 = vadd.f32 %v2891_v1, %v849_v31  ;;  %v815_v6 = vmul.f32 %v2303_v5, %v2847_v44 }
 0x23a   :  { %v816_v12 = vmul.f32 %v2305_v0, %v2850_v39  ;;  %v886_v25 = vadd.f32 %v2891_v1, %v850_v35 }
 0x23b   :  { %2202 = vmatprep.mubr.msk.bf16.mxu1 %vm400_vm2, %v934_v32  ;;  %v917_v27 = vmax.f32 %v885_v4, 0.0  ;;  %v851_v16 = vmul.f32 %v2885_v30, %v815_v6 }
 0x23c   :  { %v2307_v9 = vpop.eup %2306  ;;  %v852_v11 = vmul.f32 %v2885_v30, %v816_v12  ;;  %v918_v18 = vmax.f32 %v886_v25, 0.0 }
 0x23d   :  { %v935_v8 = vpack.c.bf16 %v917_v27, %v916_v26  ;;  %v887_v54 = vadd.f32 %v2891_v1, %v851_v16  ;;  %v817_v23 = vmul.f32 %v2307_v9, %v2859_v56  ;;  %v3007_v56 = vld [vmem:[%s3657_s3 + $0x3] ss:$0 sm:$0xff] }
 0x23e   :  { %v888_v59 = vadd.f32 %v2891_v1, %v852_v11 }
 0x23f   :  { %v919_v44 = vmax.f32 %v887_v54, 0.0  ;;  %v853_v39 = vmul.f32 %v2885_v30, %v817_v23 }
 0x240   :  { %2203 = vmatmul.mubr.msk.bf16.gmra.mxu1 %vm400_vm2, %v935_v8  ;;  %v920_v60 = vmax.f32 %v888_v59, 0.0 }
 0x241   :  { %v936_v19 = vpack.c.bf16 %v919_v44, %v918_v18  ;;  %v889_v57 = vadd.f32 %v2891_v1, %v853_v39 }
 0x243   :  { %2206 = vmatprep.mubr.msk.bf16.mxu1 %vm400_vm2, %v936_v19  ;;  %v921_v22 = vmax.f32 %v889_v57, 0.0 }
 0x245   :  { %v937_v49 = vpack.c.bf16 %v921_v22, %v920_v60 }
 0x248   :  { %2207 = vmatmul.mubr.msk.bf16.gmra.mxu1 %vm400_vm2, %v937_v49 }
 0x2d0   :  { %v2180_v30 = vpop.f32.mrf.mxu1 }
 0x2d1   :  { %v3010_v58 = vadd.f32 %v2180_v30, %v3007_v56 }
 0x2d2   :  { %v1057_v61 = vpop.f32.mrf.mxu1 }
 0x2d3   :  { %v3013_v1 = vadd.f32 %v3007_v56, %v1057_v61  ;;  %v1193_v50 = vsel %vm1186_vm3, %v3010_v58, 0.0 }
 0x2d4   :  { %1194 = vadd.xlane.f32.xlu0 %v1193_v50  ;;  %v2181_v43 = vpop.f32.mrf.mxu1 }
 0x2d5   :  { %v3018_v51 = vadd.f32 %v2181_v43, %v3007_v56  ;;  %v1187_v3 = vsel %vm1186_vm3, %v3013_v1, 0.0 }
 0x2d6   :  { %v1060_v33 = vpop.f32.mrf.mxu1 }
 0x2d7   :  { %v3021_v42 = vadd.f32 %v3007_v56, %v1060_v33  ;;  %v1196_v52 = vsel %vm1186_vm3, %v3018_v51, 0.0 }
 0x2d8   :  { %1197 = vadd.xlane.f32.xlu1 %v1196_v52  ;;  %1188 = vadd.xlane.f32.xlu0 %v1187_v3  ;;  %v2184_v62 = vpop.f32.mrf.mxu1 }
 0x2d9   :  { %v3028_v10 = vadd.f32 %v2184_v62, %v3007_v56  ;;  %v1190_v37 = vsel %vm1186_vm3, %v3021_v42, 0.0 }
 0x2da   :  { %v1073_v2 = vpop.f32.mrf.mxu1 }
 0x2db   :  { %v3031_v46 = vadd.f32 %v3007_v56, %v1073_v2  ;;  %v1205_v63 = vsel %vm1186_vm3, %v3028_v10, 0.0 }
 0x2dc   :  { %1191 = vadd.xlane.f32.xlu1 %v1190_v37  ;;  %1206 = vadd.xlane.f32.xlu0 %v1205_v63  ;;  %v2185_v55 = vpop.f32.mrf.mxu1 }
 0x2dd   :  { %v3038_v24 = vadd.f32 %v2185_v55, %v3007_v56  ;;  %v1199_v29 = vsel %vm1186_vm3, %v3031_v46, 0.0 }
 0x2de   :  { %v1076_v14 = vpop.f32.mrf.mxu1 }
 0x2df   :  { %v3041_v41 = vadd.f32 %v3007_v56, %v1076_v14  ;;  %v1208_v28 = vsel %vm1186_vm3, %v3038_v24, 0.0 }
 0x2e0   :  { %1209 = vadd.xlane.f32.xlu1 %v1208_v28  ;;  %1200 = vadd.xlane.f32.xlu0 %v1199_v29  ;;  %v2188_v13 = vpop.f32.mrf.mxu1 }
 0x2e1   :  { %v3048_v15 = vadd.f32 %v2188_v13, %v3007_v56  ;;  %v1202_v5 = vsel %vm1186_vm3, %v3041_v41, 0.0 }
 0x2e2   :  { %v1089_v31 = vpop.f32.mrf.mxu1 }
 0x2e3   :  { %v3051_v40 = vadd.f32 %v3007_v56, %v1089_v31  ;;  %v1217_v35 = vsel %vm1186_vm3, %v3048_v15, 0.0 }
 0x2e4   :  { %1203 = vadd.xlane.f32.xlu1 %v1202_v5  ;;  %1218 = vadd.xlane.f32.xlu0 %v1217_v35  ;;  %v2189_v0 = vpop.f32.mrf.mxu1 }
 0x2e5   :  { %v3058_v32 = vadd.f32 %v2189_v0, %v3007_v56  ;;  %v1211_v26 = vsel %vm1186_vm3, %v3051_v40, 0.0 }
 0x2e6   :  { %v1092_v4 = vpop.f32.mrf.mxu1 }
 0x2e7   :  { %v3061_v6 = vadd.f32 %v3007_v56, %v1092_v4  ;;  %v1220_v12 = vsel %vm1186_vm3, %v3058_v32, 0.0 }
 0x2e8   :  { %1221 = vadd.xlane.f32.xlu1 %v1220_v12  ;;  %1212 = vadd.xlane.f32.xlu0 %v1211_v26  ;;  %v2192_v27 = vpop.f32.mrf.mxu1 }
 0x2e9   :  { %v3068_v16 = vadd.f32 %v2192_v27, %v3007_v56  ;;  %v1214_v11 = vsel %vm1186_vm3, %v3061_v6, 0.0 }
 0x2ea   :  { %v1105_v25 = vpop.f32.mrf.mxu1 }
 0x2eb   :  { %v3071_v9 = vadd.f32 %v3007_v56, %v1105_v25  ;;  %v1229_v8 = vsel %vm1186_vm3, %v3068_v16, 0.0 }
 0x2ec   :  { %1215 = vadd.xlane.f32.xlu1 %v1214_v11  ;;  %1230 = vadd.xlane.f32.xlu0 %v1229_v8  ;;  %v2193_v54 = vpop.f32.mrf.mxu1 }
 0x2ed   :  { %v3078_v23 = vadd.f32 %v2193_v54, %v3007_v56  ;;  %v1223_v59 = vsel %vm1186_vm3, %v3071_v9, 0.0 }
 0x2ee   :  { %v1108_v18 = vpop.f32.mrf.mxu1 }
 0x2ef   :  { %v3081_v44 = vadd.f32 %v3007_v56, %v1108_v18  ;;  %v1232_v39 = vsel %vm1186_vm3, %v3078_v23, 0.0 }
 0x2f0   :  { %1233 = vadd.xlane.f32.xlu1 %v1232_v39  ;;  %1224 = vadd.xlane.f32.xlu0 %v1223_v59  ;;  %v2196_v19 = vpop.f32.mrf.mxu1 }
 0x2f1   :  { %v3088_v57 = vadd.f32 %v2196_v19, %v3007_v56  ;;  %v1226_v49 = vsel %vm1186_vm3, %v3081_v44, 0.0 }
 0x2f2   :  { %v1121_v60 = vpop.f32.mrf.mxu1 }
 0x2f3   :  { %v3091_v22 = vadd.f32 %v3007_v56, %v1121_v60  ;;  %v1241_v30 = vsel %vm1186_vm3, %v3088_v57, 0.0 }
 0x2f4   :  { %1227 = vadd.xlane.f32.xlu1 %v1226_v49  ;;  %1242 = vadd.xlane.f32.xlu0 %v1241_v30  ;;  %v2197_v61 = vpop.f32.mrf.mxu1 }
 0x2f5   :  { %v3098_v50 = vadd.f32 %v2197_v61, %v3007_v56  ;;  %v1235_v3 = vsel %vm1186_vm3, %v3091_v22, 0.0 }
 0x2f6   :  { %v1124_v43 = vpop.f32.mrf.mxu1 }
 0x2f7   :  { %v3101_v33 = vadd.f32 %v3007_v56, %v1124_v43  ;;  %v1244_v52 = vsel %vm1186_vm3, %v3098_v50, 0.0 }
 0x2f8   :  { %1245 = vadd.xlane.f32.xlu1 %v1244_v52  ;;  %1236 = vadd.xlane.f32.xlu0 %v1235_v3  ;;  %v2200_v62 = vpop.f32.mrf.mxu1 }
 0x2f9   :  { %v3108_v2 = vadd.f32 %v2200_v62, %v3007_v56  ;;  %v1238_v55 = vsel %vm1186_vm3, %v3101_v33, 0.0 }
 0x2fa   :  { %v1137_v37 = vpop.f32.mrf.mxu1 }
 0x2fb   :  { %v3111_v63 = vadd.f32 %v3007_v56, %v1137_v37  ;;  %v1253_v14 = vsel %vm1186_vm3, %v3108_v2, 0.0 }
 0x2fc   :  { %1239 = vadd.xlane.f32.xlu1 %v1238_v55  ;;  %1254 = vadd.xlane.f32.xlu0 %v1253_v14  ;;  %v2201_v28 = vpop.f32.mrf.mxu1 }
 0x2fd   :  { %v3118_v29 = vadd.f32 %v2201_v28, %v3007_v56  ;;  %v1247_v35 = vsel %vm1186_vm3, %v3111_v63, 0.0 }
 0x2fe   :  { %v1140_v13 = vpop.f32.mrf.mxu1 }
 0x2ff   :  { %v3121_v31 = vadd.f32 %v3007_v56, %v1140_v13  ;;  %v1256_v5 = vsel %vm1186_vm3, %v3118_v29, 0.0  ;;  %v3169_v13 = vpop.permute.xlu1 %1738 }
 0x300   :  { %1257 = vadd.xlane.f32.xlu1 %v1256_v5  ;;  %1248 = vadd.xlane.f32.xlu0 %v1247_v35  ;;  %v2204_v0 = vpop.f32.mrf.mxu1 }
 0x301   :  { %v3128_v4 = vadd.f32 %v2204_v0, %v3007_v56  ;;  %v1250_v27 = vsel %vm1186_vm3, %v3121_v31, 0.0  ;;  %v3177_v0 = vpop.permute.xlu0 %1736 }
 0x302   :  { %v1153_v12 = vpop.f32.mrf.mxu1 }
 0x303   :  { %v3131_v26 = vadd.f32 %v3007_v56, %v1153_v12  ;;  %v1265_v25 = vsel %vm1186_vm3, %v3128_v4, 0.0  ;;  %v3171_v5 = vpop.permute.xlu1 %1768 }
 0x304   :  { %1251 = vadd.xlane.f32.xlu1 %v1250_v27  ;;  %1266 = vadd.xlane.f32.xlu0 %v1265_v25  ;;  %v2205_v11 = vpop.f32.mrf.mxu1 }
 0x305   :  { %v3138_v8 = vadd.f32 %v2205_v11, %v3007_v56  ;;  %v1259_v59 = vsel %vm1186_vm3, %v3131_v26, 0.0  ;;  %v3181_v27 = vpop.permute.xlu0 %1732 }
 0x306   :  { %v1156_v54 = vpop.f32.mrf.mxu1 }
 0x307   :  { %v3141_v18 = vadd.f32 %v3007_v56, %v1156_v54  ;;  %v1268_v39 = vsel %vm1186_vm3, %v3138_v8, 0.0  ;;  %v3173_v35 = vpop.permute.xlu1 %1770 }
 0x308   :  { %1269 = vadd.xlane.f32.xlu1 %v1268_v39  ;;  %1260 = vadd.xlane.f32.xlu0 %v1259_v59  ;;  %v2208_v19 = vpop.f32.mrf.mxu1 }
 0x309   :  { %v3148_v60 = vadd.f32 %v2208_v19, %v3007_v56  ;;  %v1262_v61 = vsel %vm1186_vm3, %v3141_v18, 0.0 }
 0x30a   :  { %v1169_v49 = vpop.f32.mrf.mxu1 }
 0x30b   :  { %v3151_v30 = vadd.f32 %v3007_v56, %v1169_v49  ;;  %v1277_v43 = vsel %vm1186_vm3, %v3148_v60, 0.0 }
 0x30c   :  { %1263 = vadd.xlane.f32.xlu1 %v1262_v61  ;;  %1278 = vadd.xlane.f32.xlu0 %v1277_v43  ;;  %v2209_v52 = vpop.f32.mrf.mxu1 }
 0x30d   :  { %v3158_v3 = vadd.f32 %v2209_v52, %v3007_v56  ;;  %v1271_v14 = vsel %vm1186_vm3, %v3151_v30, 0.0 }
 0x30e   :  { %v1172_v62 = vpop.f32.mrf.mxu1 }
 0x30f   :  { %v3161_v37 = vadd.f32 %v3007_v56, %v1172_v62  ;;  %v1280_v55 = vsel %vm1186_vm3, %v3158_v3, 0.0  ;;  %v3175_v56 = vpop.permute.xlu1 %1734 }
 0x310   :  { %1281 = vadd.xlane.f32.xlu1 %v1280_v55  ;;  %1272 = vadd.xlane.f32.xlu0 %v1271_v14 }
 0x311   :  { %v1274_v28 = vsel %vm1186_vm3, %v3161_v37, 0.0 }
 0x313   :  { %v3179_v12 = vpop.permute.xlu1 %1764 }
 0x314   :  { %1275 = vadd.xlane.f32.xlu1 %v1274_v28 }
 0x317   :  { %v3183_v25 = vpop.permute.xlu1 %1766 }
 0x35d   :  { %v1195_v11 = vpop.xlane.xlu0 %1194 }
 0x35e   :  { %v1286_v54 = vmul.f32 0.03125, %v1195_v11 }
 0x360   :  { %v3186_v39 = vsub.f32 %v3010_v58, %v1286_v54 }
 0x361   :  { %v1198_v59 = vpop.xlane.xlu1 %1197  ;;  %v3188_v19 = vpop.xlane.xlu0 %1188 }
 0x362   :  { %3703 = vst [vmem:[#allocation19_spill] sm:$0xff] %v3186_v39  ;;  %v1287_v49 = vmul.f32 0.03125, %v1198_v59  ;;  %v1350_v61 = vmul.f32 %v3186_v39, %v3186_v39 }
 0x364   :  { %v3193_v43 = vsub.f32 %v3018_v51, %v1287_v49  ;;  %v1386_v52 = vsel %vm1186_vm3, %v1350_v61, 0.0 }
 0x365   :  { %v3196_v62 = vpop.xlane.xlu1 %1191  ;;  %1387 = vadd.xlane.f32.xlu0 %v1386_v52  ;;  %v1207_v55 = vpop.xlane.xlu0 %1206 }
 0x366   :  { %3704 = vst [vmem:[#allocation20_spill] sm:$0xff] %v3193_v43  ;;  %v1290_v14 = vmul.f32 0.03125, %v1207_v55  ;;  %v1351_v58 = vmul.f32 %v3193_v43, %v3193_v43 }
 0x368   :  { %v3201_v28 = vsub.f32 %v3028_v10, %v1290_v14  ;;  %v1389_v11 = vsel %vm1186_vm3, %v1351_v58, 0.0 }
 0x369   :  { %v1210_v54 = vpop.xlane.xlu1 %1209  ;;  %1390 = vadd.xlane.f32.xlu1 %v1389_v11  ;;  %v1201_v59 = vpop.xlane.xlu0 %1200 }
 0x36a   :  { %3705 = vst [vmem:[#allocation21_spill] sm:$0xff] %v3201_v28  ;;  %v1291_v51 = vmul.f32 0.03125, %v1210_v54  ;;  %v1288_v49 = vmul.f32 0.03125, %v1201_v59  ;;  %v1354_v61 = vmul.f32 %v3201_v28, %v3201_v28 }
 0x36c   :  { %v3207_v52 = vsub.f32 %v3038_v24, %v1291_v51  ;;  %v3210_v55 = vsub.f32 %v3031_v46, %v1288_v49  ;;  %v1398_v43 = vsel %vm1186_vm3, %v1354_v61, 0.0 }
 0x36d   :  { %v1204_v10 = vpop.xlane.xlu1 %1203  ;;  %1399 = vadd.xlane.f32.xlu0 %v1398_v43  ;;  %v1219_v14 = vpop.xlane.xlu0 %1218 }
 0x36e   :  { %3706 = vst [vmem:[#allocation22_spill] sm:$0xff] %v3207_v52  ;;  %3707 = vst [vmem:[#allocation23_spill] sm:$0xff] %v3210_v55  ;;  %v1289_v58 = vmul.f32 0.03125, %v1204_v10  ;;  %v1294_v39 = vmul.f32 0.03125, %v1219_v14  ;;  %v1355_v11 = vmul.f32 %v3207_v52, %v3207_v52  ;;  %v1352_v54 = vmul.f32 %v3210_v55, %v3210_v55 }
 0x370   :  { %v3218_v59 = vsub.f32 %v3041_v41, %v1289_v58  ;;  %v3221_v24 = vsub.f32 %v3048_v15, %v1294_v39  ;;  %v1401_v46 = vsel %vm1186_vm3, %v1355_v11, 0.0  ;;  %v1392_v51 = vsel %vm1186_vm3, %v1352_v54, 0.0 }
 0x371   :  { %v1222_v43 = vpop.xlane.xlu1 %1221  ;;  %1402 = vadd.xlane.f32.xlu1 %v1401_v46  ;;  %1393 = vadd.xlane.f32.xlu0 %v1392_v51  ;;  %v1213_v49 = vpop.xlane.xlu0 %1212 }
 0x372   :  { %3708 = vst [vmem:[#allocation24_spill] sm:$0xff] %v3218_v59  ;;  %v1295_v61 = vmul.f32 0.03125, %v1222_v43  ;;  %v1292_v10 = vmul.f32 0.03125, %v1213_v49  ;;  %v1353_v14 = vmul.f32 %v3218_v59, %v3218_v59  ;;  %v1358_v41 = vmul.f32 %v3221_v24, %v3221_v24 }
 0x374   :  { %v3230_v58 = vsub.f32 %v3058_v32, %v1295_v61  ;;  %v3233_v15 = vsub.f32 %v3051_v40, %v1292_v10  ;;  %v1395_v39 = vsel %vm1186_vm3, %v1353_v14, 0.0  ;;  %v1410_v11 = vsel %vm1186_vm3, %v1358_v41, 0.0 }
 0x375   :  { %v1216_v54 = vpop.xlane.xlu1 %1215  ;;  %1396 = vadd.xlane.f32.xlu1 %v1395_v39  ;;  %1411 = vadd.xlane.f32.xlu0 %v1410_v11  ;;  %v1231_v46 = vpop.xlane.xlu0 %1230 }
 0x376   :  { %v1293_v51 = vmul.f32 0.03125, %v1216_v54  ;;  %v1298_v43 = vmul.f32 0.03125, %v1231_v46  ;;  %v1359_v49 = vmul.f32 %v3230_v58, %v3230_v58  ;;  %v1356_v32 = vmul.f32 %v3233_v15, %v3233_v15 }
 0x378   :  { %v3242_v61 = vsub.f32 %v3061_v6, %v1293_v51  ;;  %v3245_v40 = vsub.f32 %v3068_v16, %v1298_v43  ;;  %v1413_v10 = vsel %vm1186_vm3, %v1359_v49, 0.0  ;;  %v1404_v14 = vsel %vm1186_vm3, %v1356_v32, 0.0 }
 0x379   :  { %v1234_v41 = vpop.xlane.xlu1 %1233  ;;  %1414 = vadd.xlane.f32.xlu1 %v1413_v10  ;;  %1405 = vadd.xlane.f32.xlu0 %v1404_v14  ;;  %v1225_v39 = vpop.xlane.xlu0 %1224 }
 0x37a   :  { %v1299_v11 = vmul.f32 0.03125, %v1234_v41  ;;  %v1296_v54 = vmul.f32 0.03125, %v1225_v39  ;;  %v1357_v46 = vmul.f32 %v3242_v61, %v3242_v61  ;;  %v1362_v6 = vmul.f32 %v3245_v40, %v3245_v40 }
 0x37c   :  { %v3254_v51 = vsub.f32 %v3078_v23, %v1299_v11  ;;  %v3257_v16 = vsub.f32 %v3071_v9, %v1296_v54  ;;  %v1407_v43 = vsel %vm1186_vm3, %v1357_v46, 0.0  ;;  %v1422_v49 = vsel %vm1186_vm3, %v1362_v6, 0.0 }
 0x37d   :  { %v1228_v32 = vpop.xlane.xlu1 %1227  ;;  %1408 = vadd.xlane.f32.xlu1 %v1407_v43  ;;  %1423 = vadd.xlane.f32.xlu0 %v1422_v49  ;;  %v1243_v10 = vpop.xlane.xlu0 %1242 }
 0x37e   :  { %v1297_v14 = vmul.f32 0.03125, %v1228_v32  ;;  %v1302_v41 = vmul.f32 0.03125, %v1243_v10  ;;  %v1363_v39 = vmul.f32 %v3254_v51, %v3254_v51  ;;  %v1360_v23 = vmul.f32 %v3257_v16, %v3257_v16 }
 0x380   :  { %v3266_v11 = vsub.f32 %v3081_v44, %v1297_v14  ;;  %v3269_v9 = vsub.f32 %v3088_v57, %v1302_v41  ;;  %v1425_v54 = vsel %vm1186_vm3, %v1363_v39, 0.0  ;;  %v1416_v46 = vsel %vm1186_vm3, %v1360_v23, 0.0 }
 0x381   :  { %v1246_v6 = vpop.xlane.xlu1 %1245  ;;  %1426 = vadd.xlane.f32.xlu1 %v1425_v54  ;;  %1417 = vadd.xlane.f32.xlu0 %v1416_v46  ;;  %v3273_v43 = vpop.xlane.xlu0 %1236 }
 0x382   :  { %3709 = vst [vmem:[#allocation25_spill] sm:$0xff] %v3269_v9  ;;  %v1303_v49 = vmul.f32 0.03125, %v1246_v6  ;;  %v1361_v32 = vmul.f32 %v3266_v11, %v3266_v11  ;;  %v1366_v44 = vmul.f32 %v3269_v9, %v3269_v9 }
 0x384   :  { %v3280_v10 = vsub.f32 %v3098_v50, %v1303_v49  ;;  %v1419_v57 = vsel %vm1186_vm3, %v1361_v32, 0.0  ;;  %v1434_v14 = vsel %vm1186_vm3, %v1366_v44, 0.0 }
 0x385   :  { %v3284_v41 = vpop.xlane.xlu1 %1239  ;;  %1420 = vadd.xlane.f32.xlu1 %v1419_v57  ;;  %1435 = vadd.xlane.f32.xlu0 %v1434_v14  ;;  %v1255_v39 = vpop.xlane.xlu0 %1254 }
 0x386   :  { %3710 = vst [vmem:[#allocation26_spill] sm:$0xff] %v3280_v10  ;;  %v1306_v23 = vmul.f32 0.03125, %v1255_v39  ;;  %v1367_v54 = vmul.f32 %v3280_v10, %v3280_v10 }
 0x388   :  { %v3289_v46 = vsub.f32 %v3108_v2, %v1306_v23  ;;  %v1437_v6 = vsel %vm1186_vm3, %v1367_v54, 0.0 }
 0x389   :  { %v1258_v50 = vpop.xlane.xlu1 %1257  ;;  %1438 = vadd.xlane.f32.xlu0 %v1437_v6  ;;  %v1249_v49 = vpop.xlane.xlu0 %1248 }
 0x38a   :  { %3711 = vst [vmem:[#allocation27_spill] sm:$0xff] %v3289_v46  ;;  %v1307_v32 = vmul.f32 0.03125, %v1258_v50  ;;  %v1304_v9 = vmul.f32 0.03125, %v1249_v49  ;;  %v1370_v44 = vmul.f32 %v3289_v46, %v3289_v46 }
 0x38c   :  { %v3295_v57 = vsub.f32 %v3118_v29, %v1307_v32  ;;  %v3298_v14 = vsub.f32 %v3111_v63, %v1304_v9  ;;  %v1446_v39 = vsel %vm1186_vm3, %v1370_v44, 0.0 }
 0x38d   :  { %v1252_v2 = vpop.xlane.xlu1 %1251  ;;  %1447 = vadd.xlane.f32.xlu0 %v1446_v39  ;;  %v1267_v23 = vpop.xlane.xlu0 %1266 }
 0x38e   :  { %3712 = vst [vmem:[#allocation28_spill] sm:$0xff] %v3295_v57  ;;  %3713 = vst [vmem:[#allocation29_spill] sm:$0xff] %v3298_v14  ;;  %v1305_v54 = vmul.f32 0.03125, %v1252_v2  ;;  %v1310_v10 = vmul.f32 0.03125, %v1267_v23  ;;  %v1371_v6 = vmul.f32 %v3295_v57, %v3295_v57  ;;  %v1368_v50 = vmul.f32 %v3298_v14, %v3298_v14 }
 0x390   :  { %v3306_v49 = vsub.f32 %v3121_v31, %v1305_v54  ;;  %v3309_v29 = vsub.f32 %v3128_v4, %v1310_v10  ;;  %v1449_v63 = vsel %vm1186_vm3, %v1371_v6, 0.0  ;;  %v1440_v9 = vsel %vm1186_vm3, %v1368_v50, 0.0 }
 0x391   :  { %v1270_v32 = vpop.xlane.xlu1 %1269  ;;  %1450 = vadd.xlane.f32.xlu1 %v1449_v63  ;;  %1441 = vadd.xlane.f32.xlu0 %v1440_v9  ;;  %v1261_v44 = vpop.xlane.xlu0 %1260 }
 0x392   :  { %3714 = vst [vmem:[#allocation30_spill] sm:$0xff] %v3306_v49  ;;  %v1311_v39 = vmul.f32 0.03125, %v1270_v32  ;;  %v1308_v2 = vmul.f32 0.03125, %v1261_v44  ;;  %v1369_v23 = vmul.f32 %v3306_v49, %v3306_v49  ;;  %v1374_v31 = vmul.f32 %v3309_v29, %v3309_v29 }
 0x394   :  { %v3318_v54 = vsub.f32 %v3138_v8, %v1311_v39  ;;  %v3321_v4 = vsub.f32 %v3131_v26, %v1308_v2  ;;  %v1443_v10 = vsel %vm1186_vm3, %v1369_v23, 0.0  ;;  %v1458_v44 = vsel %vm1186_vm3, %v1374_v31, 0.0 }
 0x395   :  { %v1264_v6 = vpop.xlane.xlu1 %1263  ;;  %1444 = vadd.xlane.f32.xlu0 %v1443_v10  ;;  %v1279_v50 = vpop.xlane.xlu0 %1278 }
 0x396   :  { %v1309_v63 = vmul.f32 0.03125, %v1264_v6  ;;  %v1314_v9 = vmul.f32 0.03125, %v1279_v50  ;;  %v1375_v32 = vmul.f32 %v3318_v54, %v3318_v54  ;;  %v1372_v39 = vmul.f32 %v3321_v4, %v3321_v4 }
 0x398   :  { %v3328_v49 = vsub.f32 %v3141_v18, %v1309_v63  ;;  %v3331_v8 = vsub.f32 %v3148_v60, %v1314_v9  ;;  %v1461_v26 = vsel %vm1186_vm3, %v1375_v32, 0.0  ;;  %v1452_v60 = vsel %vm1186_vm3, %v1372_v39, 0.0 }
 0x399   :  { %1462 = vadd.xlane.f32.xlu1 %v1461_v26  ;;  %1459 = vadd.xlane.f32.xlu0 %v1458_v44  ;;  %v1273_v2 = vpop.xlane.xlu0 %1272  ;;  %v392_v32 = vmax.f32 %v2624_v38, 0.0  ;;  %v376_v44 = vmax.f32 %v2544_v47, 0.0  ;;  %v1282_v26 = vpop.xlane.xlu1 %1281  ;;  %v1300_v38 = vmul.f32 0.03125, %v3273_v43 }
 0x39a   :  { %3715 = vst [vmem:[#allocation31_spill] sm:$0xff] %v3328_v49  ;;  %v1312_v23 = vmul.f32 0.03125, %v1273_v2  ;;  %v1373_v10 = vmul.f32 %v3328_v49, %v3328_v49  ;;  %v1378_v6 = vmul.f32 %v3331_v8, %v3331_v8  ;;  %v1315_v39 = vmul.f32 0.03125, %v1282_v26 }
 0x39c   :  { %v3339_v31 = vsub.f32 %v3151_v30, %v1312_v23  ;;  %v1455_v18 = vsel %vm1186_vm3, %v1373_v10, 0.0  ;;  %v1470_v50 = vsel %vm1186_vm3, %v1378_v6, 0.0  ;;  %v377_v30 = vmax.f32 %v2554_v53, 0.0 }
 0x39d   :  { %1456 = vadd.xlane.f32.xlu1 %v1455_v18  ;;  %1453 = vadd.xlane.f32.xlu0 %v1452_v60  ;;  %v1276_v2 = vpop.xlane.xlu1 %1275  ;;  %v1284_v23 = vmul.f32 0.03125, %v3188_v19  ;;  %v3357_v10 = vsub.f32 %v3158_v3, %v1315_v39  ;;  %v3371_v19 = vsub.f32 %v3091_v22, %v1300_v38  ;;  %v1301_v3 = vmul.f32 0.03125, %v3284_v41 }
 0x39e   :  { %v1376_v63 = vmul.f32 %v3339_v31, %v3339_v31  ;;  %v1313_v18 = vmul.f32 0.03125, %v1276_v2  ;;  %v388_v39 = vmax.f32 %v2604_v20, 0.0  ;;  %v368_v20 = vmax.f32 %v2503_v21, 0.0  ;;  %v3721_v21 = vld [vmem:[#allocation12_spill] sm:$0xff] }
 0x39f   :  { %v3360_v53 = vsub.f32 %v3013_v1, %v1284_v23  ;;  %v1379_v47 = vmul.f32 %v3357_v10, %v3357_v10  ;;  %3717 = vst [vmem:[#allocation33_spill] sm:$0xff] %v3371_v19  ;;  %v1285_v23 = vmul.f32 0.03125, %v3196_v62 }
 0x3a0   :  { %v1464_v9 = vsel %vm1186_vm3, %v1376_v63, 0.0  ;;  %v3364_v60 = vsub.f32 %v3161_v37, %v1313_v18  ;;  %v3378_v37 = vsub.f32 %v3101_v33, %v1301_v3  ;;  %v393_v33 = vmax.f32 %v2634_v48, 0.0 }
 0x3a1   :  { %1471 = vadd.xlane.f32.xlu0 %v1470_v50  ;;  %3716 = vst [vmem:[#allocation32_spill] sm:$0xff] %v3360_v53  ;;  %v1348_v6 = vmul.f32 %v3360_v53, %v3360_v53  ;;  %v1473_v50 = vsel %vm1186_vm3, %v1379_v47, 0.0  ;;  %v370_v48 = vmax.f32 %v2523_v34, 0.0  ;;  %v3407_v18 = vsub.f32 %v3021_v42, %v1285_v23  ;;  %v3720_v42 = vld [vmem:[#allocation6_spill] sm:$0xff] }
 0x3a2   :  { %v1377_v1 = vmul.f32 %v3364_v60, %v3364_v60  ;;  %3718 = vst [vmem:[#allocation34_spill] sm:$0xff] %v3378_v37  ;;  %v1365_v41 = vmul.f32 %v3378_v37, %v3378_v37  ;;  %v384_v34 = vmax.f32 %v2584_v7, 0.0  ;;  %v382_v3 = vmax.f32 %v3721_v21, 0.0 }
 0x3a3   :  { %v1380_v63 = vsel %vm1186_vm3, %v1348_v6, 0.0  ;;  %3719 = vst [vmem:[#allocation35_spill] sm:$0xff] %v3407_v18  ;;  %v1349_v38 = vmul.f32 %v3407_v18, %v3407_v18  ;;  %v366_v6 = vmax.f32 %v3720_v42, 0.0 }
 0x3a4   :  { %v1467_v43 = vsel %vm1186_vm3, %v1377_v1, 0.0 }
 0x3a5   :  { %1465 = vadd.xlane.f32.xlu0 %v1464_v9  ;;  %v1364_v9 = vmul.f32 %v3371_v19, %v3371_v19  ;;  %v1383_v62 = vsel %vm1186_vm3, %v1349_v38, 0.0 }
 0x3a7   :  { %v1428_v22 = vsel %vm1186_vm3, %v1364_v9, 0.0  ;;  %v3723_v9 = vld [vmem:[#allocation17_spill] sm:$0xff] }
 0x3ae   :  { %1730 = vrot.lane.b32.xlu1 %v377_v30, %s2394_s2  ;;  %v1431_v30 = vsel %vm1186_vm3, %v1365_v41, 0.0 }
 0x3b2   :  { %1760 = vrot.lane.b32.xlu1 %v392_v32, %s2394_s2  ;;  %v374_v32 = vmax.f32 %v2541_v45, 0.0 }
 0x3bb   :  { %1728 = vrot.lane.b32.xlu0 %v376_v44, %s2394_s2  ;;  %v372_v44 = vmax.f32 %v2526_v36, 0.0  ;;  %v386_v36 = vmax.f32 %v2601_v17, 0.0 }
 0x3d6   :  { %1474 = vadd.xlane.f32.xlu1 %v1473_v50 }
 0x3da   :  { %1468 = vadd.xlane.f32.xlu1 %v1467_v43  ;;  %1381 = vadd.xlane.f32.xlu0 %v1380_v63  ;;  %v3722_v43 = vld [vmem:[#allocation11_spill] sm:$0xff] }
 0x3db   :  { %v375_v63 = vmax.f32 %v3722_v43, 0.0 }
 0x3de   :  { %1429 = vadd.xlane.f32.xlu0 %v1428_v22  ;;  %v390_v22 = vmax.f32 %v3723_v9, 0.0 }
 0x3e2   :  { %1432 = vadd.xlane.f32.xlu0 %v1431_v30 }
 0x3eb   :  { %1762 = vrot.lane.b32.xlu1 %v393_v33, %s2394_s2  ;;  %v3724_v33 = vld [vmem:[#allocation18_spill] sm:$0xff] }
 0x3ee   :  { %v3393_v26 = vpop.xlane.xlu0 %1387 }
 0x3f2   :  { %v3426_v7 = vpop.xlane.xlu1 %1390 }
 0x3f6   :  { %v3397_v2 = vpop.xlane.xlu0 %1399 }
 0x3f8   :  { %1724 = vrot.lane.b32.xlu0 %v374_v32, %s2394_s2  ;;  %v391_v32 = vmax.f32 %v3724_v33, 0.0 }
 0x3fa   :  { %v3403_v45 = vpop.xlane.xlu0 %1393  ;;  %v3430_v41 = vpop.xlane.xlu1 %1402 }
 0x3fc   :  { %1720 = vrot.lane.b32.xlu0 %v372_v44, %s2394_s2 }
 0x3fe   :  { %v3413_v47 = vpop.xlane.xlu0 %1411  ;;  %v3437_v44 = vpop.xlane.xlu1 %1396 }
 0x400   :  { %1752 = vrot.lane.b32.xlu0 %v388_v39, %s2394_s2 }
 0x402   :  { %v3419_v17 = vpop.xlane.xlu0 %1405  ;;  %v1415_v38 = vpop.xlane.xlu1 %1414 }
 0x404   :  { %1716 = vrot.lane.b32.xlu0 %v370_v48, %s2394_s2  ;;  %v3725_v48 = vld [vmem:[#allocation10_spill] sm:$0xff] }
 0x405   :  { %v373_v23 = vmax.f32 %v3725_v48, 0.0 }
 0x406   :  { %v1424_v50 = vpop.xlane.xlu0 %1423 }
 0x408   :  { %1748 = vrot.lane.b32.xlu0 %v386_v36, %s2394_s2  ;;  %v3726_v36 = vld [vmem:[#allocation16_spill] sm:$0xff] }
 0x40a   :  { %v1418_v1 = vpop.xlane.xlu0 %1417 }
 0x40c   :  { %1712 = vrot.lane.b32.xlu0 %v368_v20, %s2394_s2  ;;  %v389_v20 = vmax.f32 %v3726_v36, 0.0 }
 0x40e   :  { %v3432_v30 = vpop.xlane.xlu0 %1435 }
 0x40f   :  { %1384 = vadd.xlane.f32.xlu1 %v1383_v62  ;;  %v3727_v62 = vld [vmem:[#allocation9_spill] sm:$0xff] }
 0x410   :  { %1744 = vrot.lane.b32.xlu0 %v384_v34, %s2394_s2  ;;  %v371_v42 = vmax.f32 %v3727_v62, 0.0 }
 0x412   :  { %v3439_v39 = vpop.xlane.xlu0 %1438 }
 0x414   :  { %1708 = vrot.lane.b32.xlu0 %v366_v6, %s2394_s2  ;;  %v3449_v6 = vpop.xlane.xlu1 %1408 }
 0x416   :  { %v3444_v34 = vpop.xlane.xlu0 %1447 }
 0x418   :  { %1740 = vrot.lane.b32.xlu0 %v382_v3, %s2394_s2  ;;  %v3728_v3 = vld [vmem:[#allocation15_spill] sm:$0xff] }
 0x419   :  { %v387_v43 = vmax.f32 %v3728_v3, 0.0  ;;  %v3732_v3 = vld [vmem:[#allocation13_spill] sm:$0xff] }
 0x41a   :  { %v3451_v21 = vpop.xlane.xlu0 %1441 }
 0x41e   :  { %v3456_v33 = vpop.xlane.xlu0 %1444 }
 0x420   :  { %1726 = vrot.lane.b32.xlu1 %v375_v63, %s2394_s2  ;;  %v3729_v63 = vld [vmem:[#allocation7_spill] sm:$0xff] }
 0x421   :  { %v369_v9 = vmax.f32 %v3729_v63, 0.0 }
 0x422   :  { %v1460_v36 = vpop.xlane.xlu0 %1459 }
 0x423   :  { %v1502_v28 = vmul.f32 0.03125, %v1460_v36 }
 0x424   :  { %1756 = vrot.lane.b32.xlu1 %v390_v22, %s2394_s2  ;;  %v1427_v22 = vpop.xlane.xlu1 %1426 }
 0x426   :  { %v3466_v63 = vpop.xlane.xlu0 %1453 }
 0x428   :  { %1758 = vrot.lane.b32.xlu1 %v391_v32, %s2394_s2  ;;  %v3730_v32 = vld [vmem:[#allocation14_spill] sm:$0xff] }
 0x429   :  { %v385_v48 = vmax.f32 %v3730_v32, 0.0  ;;  %v1491_v32 = vmul.f32 0.03125, %v1427_v22  ;;  %v1488_v22 = vmul.f32 0.03125, %v1418_v1 }
 0x42b   :  { %v1520_v52 = vadd.f32 1e-05, %v1488_v22 }
 0x42c   :  { %1722 = vrot.lane.b32.xlu1 %v373_v23, %s2394_s2  ;;  %v1421_v23 = vpop.xlane.xlu1 %1420 }
 0x430   :  { %1754 = vrot.lane.b32.xlu1 %v389_v20, %s2394_s2  ;;  %v3731_v20 = vld [vmem:[#allocation8_spill] sm:$0xff] }
 0x431   :  { %v367_v62 = vmax.f32 %v3731_v20, 0.0  ;;  %v1490_v20 = vmul.f32 0.03125, %v1424_v50 }
 0x433   :  { %v1522_v53 = vadd.f32 1e-05, %v1490_v20 }
 0x434   :  { %1718 = vrot.lane.b32.xlu1 %v371_v42, %s2394_s2  ;;  %v3463_v42 = vpop.xlane.xlu1 %1450 }
 0x438   :  { %1750 = vrot.lane.b32.xlu1 %v387_v43, %s2394_s2  ;;  %v383_v43 = vmax.f32 %v3732_v3, 0.0  ;;  %v1463_v37 = vpop.xlane.xlu1 %1462 }
 0x439   :  { %v1503_v46 = vmul.f32 0.03125, %v1463_v37 }
 0x43c   :  { %1714 = vrot.lane.b32.xlu1 %v369_v9, %s2394_s2  ;;  %v1868_v9 = vld [vmem:[%s3657_s3 + $0x6] sm:$0x1]  ;;  %v3474_v18 = vpop.xlane.xlu1 %1456 }
 0x43d   :  { %v3472_v19 = vpack.c.bf16 %v1868_v9, %v1868_v9 }
 0x43f   :  { %2132 = vmatprep.mubr.msk.bf16.mxu0 %vm1186_vm3, %v3472_v19 }
 0x440   :  { %1746 = vrot.lane.b32.xlu1 %v385_v48, %s2394_s2  ;;  %v1472_v48 = vpop.xlane.xlu0 %1471  ;;  %v3478_v59 = vpop.permute.xlu1 %1730 }
 0x441   :  { %v1506_v3 = vmul.f32 0.03125, %v1472_v48  ;;  %v1486_v48 = vmul.f32 0.03125, %v3413_v47 }
 0x443   :  { %v1538_v55 = vadd.f32 1e-05, %v1506_v3  ;;  %v1518_v37 = vadd.f32 1e-05, %v1486_v48 }
 0x444   :  { %1710 = vrot.lane.b32.xlu1 %v367_v62, %s2394_s2  ;;  %v1523_v62 = vadd.f32 1e-05, %v1491_v32  ;;  %v1466_v14 = vpop.xlane.xlu0 %1465  ;;  %v3480_v49 = vpop.permute.xlu1 %1760  ;;  %v1535_v32 = vadd.f32 1e-05, %v1503_v46 }
 0x445   :  { %v1504_v57 = vmul.f32 0.03125, %v1466_v14  ;;  %v1487_v14 = vmul.f32 0.03125, %v1415_v38 }
 0x446   :  { %2308 = vrsqrt.f32 %v1523_v62 }
 0x447   :  { %2310 = vrsqrt.f32 %v1522_v53  ;;  %v1536_v50 = vadd.f32 1e-05, %v1504_v57  ;;  %v1519_v3 = vadd.f32 1e-05, %v1487_v14 }
 0x448   :  { %1742 = vrot.lane.b32.xlu1 %v383_v43, %s2394_s2  ;;  %v1489_v43 = vmul.f32 0.03125, %v1421_v23  ;;  %2312 = vrsqrt.f32 %v1538_v55  ;;  %v1534_v23 = vadd.f32 1e-05, %v1502_v28 }
 0x44a   :  { %v1521_v9 = vadd.f32 1e-05, %v1489_v43 }
 0x44c   :  { %2314 = vrsqrt.f32 %v1521_v9 }
 0x44d   :  { %2316 = vrsqrt.f32 %v1536_v50 }
 0x44e   :  { %2318 = vrsqrt.f32 %v1520_v52  ;;  %v3488_v52 = vld [vmem:[%s3657_s3 + $0x4] ss:$0 sm:$0xff] }
 0x44f   :  { %2320 = vrsqrt.f32 %v1535_v32 }
 0x450   :  { %2322 = vrsqrt.f32 %v1534_v23 }
 0x453   :  { %v2309_v53 = vpop.eup %2308 }
 0x454   :  { %v2311_v57 = vpop.eup %2310  ;;  %v1587_v46 = vmul.f32 %v2309_v53, %v3254_v51 }
 0x455   :  { %v2313_v22 = vpop.eup %2312  ;;  %v1586_v28 = vmul.f32 %v2311_v57, %v3245_v40  ;;  %v3496_v40 = vld [vmem:[%s3657_s3 + $0x5] ss:$0 sm:$0xff] }
 0x456   :  { %v1623_v47 = vmul.f32 %v3488_v52, %v1587_v46  ;;  %v1602_v9 = vmul.f32 %v2313_v22, %v3331_v8 }
 0x457   :  { %v1622_v51 = vmul.f32 %v3488_v52, %v1586_v28 }
 0x458   :  { %v1659_v48 = vadd.f32 %v3496_v40, %v1623_v47 }
 0x459   :  { %v2315_v38 = vpop.eup %2314  ;;  %v1658_v8 = vadd.f32 %v3496_v40, %v1622_v51 }
 0x45a   :  { %v2317_v50 = vpop.eup %2316  ;;  %v1585_v23 = vmul.f32 %v2315_v38, %v3266_v11 }
 0x45b   :  { %v2319_v32 = vpop.eup %2318 }
 0x45c   :  { %v2321_v14 = vpop.eup %2320  ;;  %v1584_v53 = vmul.f32 %v2319_v32, %v3257_v16  ;;  %v1621_v57 = vmul.f32 %v3488_v52, %v1585_v23 }
 0x45d   :  { %v1599_v16 = vmul.f32 %v2321_v14, %v3318_v54 }
 0x45e   :  { %v1620_v46 = vmul.f32 %v3488_v52, %v1584_v53  ;;  %v1657_v38 = vadd.f32 %v3496_v40, %v1621_v57  ;;  %v1729_v53 = vpop.permute.xlu0 %1728  ;;  %v1485_v57 = vmul.f32 0.03125, %v3449_v6 }
 0x45f   :  { %v1475_v20 = vpop.xlane.xlu1 %1474  ;;  %v1635_v23 = vmul.f32 %v3488_v52, %v1599_v16 }
 0x460   :  { %v1507_v62 = vmul.f32 0.03125, %v1475_v20  ;;  %v1600_v20 = vmul.f32 %v2317_v50, %v3339_v31  ;;  %v1818_v31 = vadd.f32 %v3177_v0, %v1658_v8  ;;  %v1656_v54 = vadd.f32 %v3496_v40, %v1620_v46 }
 0x461   :  { %v1817_v8 = vadd.f32 %v3175_v56, %v1657_v38 }
 0x462   :  { %v1539_v1 = vadd.f32 1e-05, %v1507_v62  ;;  %v1638_v62 = vmul.f32 %v3488_v52, %v1602_v9  ;;  %v1636_v11 = vmul.f32 %v3488_v52, %v1600_v20 }
 0x463   :  { %v1469_v55 = vpop.xlane.xlu1 %1468 }
 0x464   :  { %2324 = vrsqrt.f32 %v1539_v1  ;;  %v1505_v36 = vmul.f32 0.03125, %v1469_v55  ;;  %v2323_v1 = vpop.eup %2322  ;;  %v1819_v55 = vadd.f32 %v3169_v13, %v1659_v48  ;;  %v1672_v51 = vadd.f32 %v3496_v40, %v1636_v11 }
 0x465   :  { %2326 = vrsqrt.f32 %v1518_v37  ;;  %v1598_v22 = vmul.f32 %v2323_v1, %v3309_v29  ;;  %v1850_v29 = vmax.f32 %v1818_v31, 0.0 }
 0x466   :  { %v1537_v43 = vadd.f32 1e-05, %v1505_v36  ;;  %v1851_v47 = vmax.f32 %v1819_v55, 0.0  ;;  %v1832_v55 = vadd.f32 %v3179_v12, %v1672_v51  ;;  %v3538_v12 = vpop.xlane.xlu0 %1381 }
 0x467   :  { %v1634_v48 = vmul.f32 %v3488_v52, %v1598_v22 }
 0x468   :  { %2328 = vrsqrt.f32 %v1537_v43  ;;  %v1864_v22 = vmax.f32 %v1832_v55, 0.0  ;;  %v1481_v55 = vmul.f32 0.03125, %v3437_v44  ;;  %v1478_v44 = vmul.f32 0.03125, %v3393_v26 }
 0x469   :  { %2330 = vrsqrt.f32 %v1519_v3  ;;  %v1674_v3 = vadd.f32 %v3496_v40, %v1638_v62  ;;  %v1494_v26 = vmul.f32 0.03125, %v3432_v30 }
 0x46b   :  { %v1834_v0 = vadd.f32 %v3171_v5, %v1674_v3  ;;  %v1877_v5 = vpack.c.bf16 %v1851_v47, %v1850_v29  ;;  %v1816_v3 = vadd.f32 %v3181_v27, %v1656_v54  ;;  %v1849_v27 = vmax.f32 %v1817_v8, 0.0 }
 0x46c   :  { %v1501_v29 = vmul.f32 0.03125, %v3474_v18  ;;  %v1498_v8 = vmul.f32 0.03125, %v3444_v34 }
 0x46d   :  { %v1848_v38 = vmax.f32 %v1816_v3, 0.0 }
 0x471   :  { %v2325_v37 = vpop.eup %2324 }
 0x472   :  { %v1603_v36 = vmul.f32 %v2325_v37, %v3357_v10  ;;  %v2327_v43 = vpop.eup %2326 }
 0x473   :  { %v1582_v32 = vmul.f32 %v2327_v43, %v3221_v24  ;;  %v1866_v24 = vmax.f32 %v1834_v0, 0.0  ;;  %v1913_v43 = vsel %vm1186_vm3, %v1877_v5, 0 }
 0x474   :  { %v1639_v28 = vmul.f32 %v3488_v52, %v1603_v36  ;;  %v1763_v36 = vpop.permute.xlu1 %1762 }
 0x475   :  { %v2329_v13 = vpop.eup %2328 }
 0x476   :  { %v2331_v10 = vpop.eup %2330  ;;  %v1601_v9 = vmul.f32 %v2329_v13, %v3364_v60  ;;  %v1675_v50 = vadd.f32 %v3496_v40, %v1639_v28  ;;  %v1484_v60 = vmul.f32 0.03125, %v3419_v17  ;;  %v1670_v17 = vadd.f32 %v3496_v40, %v1634_v48 }
 0x477   :  { %v1583_v14 = vmul.f32 %v2331_v10, %v3230_v58  ;;  %v1671_v58 = vadd.f32 %v3496_v40, %v1635_v23  ;;  %v1517_v28 = vadd.f32 1e-05, %v1485_v57  ;;  %v1482_v10 = vmul.f32 0.03125, %v3397_v2  ;;  %v3550_v23 = vpop.xlane.xlu0 %1429 }
 0x478   :  { %v1835_v20 = vadd.f32 %v3173_v35, %v1675_v50  ;;  %v1637_v62 = vmul.f32 %v3488_v52, %v1601_v9  ;;  %v1618_v35 = vmul.f32 %v3488_v52, %v1582_v32  ;;  %v1516_v31 = vadd.f32 1e-05, %v1484_v60 }
 0x479   :  { %v1619_v46 = vmul.f32 %v3488_v52, %v1583_v14  ;;  %v1831_v6 = vadd.f32 %v1763_v36, %v1671_v58  ;;  %v1830_v13 = vadd.f32 %v3480_v49, %v1670_v17  ;;  %v1500_v9 = vmul.f32 0.03125, %v3466_v63 }
 0x47a   :  { %v1867_v1 = vmax.f32 %v1835_v20, 0.0  ;;  %v1673_v37 = vadd.f32 %v3496_v40, %v1637_v62  ;;  %v1654_v47 = vadd.f32 %v3496_v40, %v1618_v35  ;;  %2332 = vrsqrt.f32 %v1516_v31 }
 0x47b   :  { %v1655_v50 = vadd.f32 %v3496_v40, %v1619_v46  ;;  %v1863_v51 = vmax.f32 %v1831_v6, 0.0  ;;  %v1876_v32 = vpack.c.bf16 %v1849_v27, %v1848_v38  ;;  %2334 = vrsqrt.f32 %v1517_v28 }
 0x47c   :  { %v1885_v11 = vpack.c.bf16 %v1867_v1, %v1866_v24  ;;  %v1833_v56 = vadd.f32 %v3183_v25, %v1673_v37  ;;  %v1814_v0 = vadd.f32 %v1729_v53, %v1654_v47  ;;  %v1483_v49 = vmul.f32 0.03125, %v3430_v41  ;;  %v3556_v41 = vpop.xlane.xlu0 %1432 }
 0x47d   :  { %v1815_v54 = vadd.f32 %v3478_v59, %v1655_v50  ;;  %v1862_v48 = vmax.f32 %v1830_v13, 0.0  ;;  %v1532_v2 = vadd.f32 1e-05, %v1500_v9  ;;  %v1514_v20 = vadd.f32 1e-05, %v1482_v10  ;;  %v3733_v10 = vld [vmem:[#allocation31_spill] sm:$0xff] }
 0x47e   :  { %2211 = vmatprep.subr.msk.bf16.mxu0 %vm1186_vm3, %v1885_v11  ;;  %v1865_v16 = vmax.f32 %v1833_v56, 0.0  ;;  %v1846_v63 = vmax.f32 %v1814_v0, 0.0  ;;  %v1910_v60 = vsel %vm1186_vm3, %v1876_v32, 0  ;;  %v1533_v14 = vadd.f32 1e-05, %v1501_v29  ;;  %v3734_v50 = vld [vmem:[#allocation21_spill] sm:$0xff] }
 0x47f   :  { %2117 = vmatpush3.bf16.xpose.msra.mxu0 %v1913_v43  ;;  %v1883_v62 = vpack.c.bf16 %v1863_v51, %v1862_v48  ;;  %v1515_v5 = vadd.f32 1e-05, %v1483_v49  ;;  %v1847_v53 = vmax.f32 %v1815_v54, 0.0  ;;  %2336 = vrsqrt.f32 %v1532_v2  ;;  %v3735_v32 = vld [vmem:[#allocation22_spill] sm:$0xff] }
 0x480   :  { %v1884_v25 = vpack.c.bf16 %v1865_v16, %v1864_v22  ;;  %2338 = vrsqrt.f32 %v1514_v20  ;;  %v1499_v59 = vmul.f32 0.03125, %v3463_v42  ;;  %v1480_v24 = vmul.f32 0.03125, %v3403_v45  ;;  %v1725_v3 = vpop.permute.xlu0 %1724 }
 0x481   :  { %v1875_v18 = vpack.c.bf16 %v1847_v53, %v1846_v63  ;;  %2340 = vrsqrt.f32 %v1533_v14  ;;  %v1530_v1 = vadd.f32 1e-05, %v1498_v8  ;;  %v1496_v42 = vmul.f32 0.03125, %v3451_v21  ;;  %v3736_v8 = vld [vmem:[#allocation27_spill] sm:$0xff] }
 0x482   :  { %2212 = vmatprep.subr.msk.bf16.mxu0 %vm1186_vm3, %v1884_v25  ;;  %2342 = vrsqrt.f32 %v1515_v5  ;;  %v1531_v57 = vadd.f32 1e-05, %v1499_v59  ;;  %v1512_v36 = vadd.f32 1e-05, %v1480_v24  ;;  %v1513_v58 = vadd.f32 1e-05, %v1481_v55 }
 0x483   :  { %v1907_v34 = vsel %vm1186_vm3, %v1875_v18, 0  ;;  %2344 = vrsqrt.f32 %v1530_v1  ;;  %v1497_v45 = vmul.f32 0.03125, %v3456_v33  ;;  %v1528_v56 = vadd.f32 1e-05, %v1496_v42 }
 0x484   :  { %2346 = vrsqrt.f32 %v1531_v57  ;;  %v1479_v43 = vmul.f32 0.03125, %v3426_v7  ;;  %v3568_v21 = vpop.permute.xlu0 %1720  ;;  %v1510_v33 = vadd.f32 1e-05, %v1478_v44  ;;  %v1495_v7 = vmul.f32 0.03125, %v3439_v39 }
 0x485   :  { %2348 = vrsqrt.f32 %v1512_v36  ;;  %v1529_v6 = vadd.f32 1e-05, %v1497_v45  ;;  %v1526_v54 = vadd.f32 1e-05, %v1494_v26  ;;  %v1476_v2 = vmul.f32 0.03125, %v3538_v12 }
 0x486   :  { %2350 = vrsqrt.f32 %v1513_v58  ;;  %v1511_v47 = vadd.f32 1e-05, %v1479_v43  ;;  %v1527_v39 = vadd.f32 1e-05, %v1495_v7  ;;  %v1492_v1 = vmul.f32 0.03125, %v3550_v23 }
 0x487   :  { %2119 = vmatpush3.bf16.xpose.msra.mxu0 %v1910_v60  ;;  %v2333_v37 = vpop.eup %2332  ;;  %2352 = vrsqrt.f32 %v1528_v56  ;;  %v1508_v55 = vadd.f32 1e-05, %v1476_v2  ;;  %v1493_v57 = vmul.f32 0.03125, %v3556_v41 }
 0x488   :  { %2213 = vmatprep.subr.msk.bf16.mxu0 %vm1186_vm3, %v1883_v62  ;;  %v2335_v35 = vpop.eup %2334  ;;  %v1580_v17 = vmul.f32 %v2333_v37, %v3233_v15  ;;  %2354 = vrsqrt.f32 %v1529_v6  ;;  %v3578_v51 = vpop.permute.xlu0 %1752  ;;  %v1524_v56 = vadd.f32 1e-05, %v1492_v1 }
 0x489   :  { %v1581_v11 = vmul.f32 %v2335_v35, %v3242_v61  ;;  %2356 = vrsqrt.f32 %v1510_v33  ;;  %v3737_v35 = vld [vmem:[#allocation28_spill] sm:$0xff]  ;;  %v1525_v6 = vadd.f32 1e-05, %v1493_v57 }
 0x48a   :  { %v1616_v31 = vmul.f32 %v3488_v52, %v1580_v17  ;;  %2358 = vrsqrt.f32 %v1511_v47 }
 0x48b   :  { %v1617_v22 = vmul.f32 %v3488_v52, %v1581_v11  ;;  %2360 = vrsqrt.f32 %v1526_v54  ;;  %v3738_v11 = vld [vmem:[#allocation23_spill] sm:$0xff] }
 0x48c   :  { %v2337_v46 = vpop.eup %2336  ;;  %v1652_v28 = vadd.f32 %v3496_v40, %v1616_v31  ;;  %2362 = vrsqrt.f32 %v1527_v39  ;;  %v3742_v39 = vld [vmem:[#allocation19_spill] sm:$0xff] }
 0x48d   :  { %v2339_v15 = vpop.eup %2338  ;;  %v1596_v13 = vmul.f32 %v2337_v46, %v3321_v4  ;;  %v1653_v38 = vadd.f32 %v3496_v40, %v1617_v22  ;;  %2364 = vrsqrt.f32 %v1508_v55  ;;  %v3739_v22 = vld [vmem:[#allocation24_spill] sm:$0xff] }
 0x48e   :  { %v2341_v16 = vpop.eup %2340  ;;  %v1812_v25 = vadd.f32 %v1725_v3, %v1652_v28  ;;  %v1578_v0 = vmul.f32 %v2339_v15, %v3734_v50 }
 0x48f   :  { %2121 = vmatpush3.bf16.xpose.msra.mxu0 %v1907_v34  ;;  %v2343_v61 = vpop.eup %2342  ;;  %v1597_v9 = vmul.f32 %v2341_v16, %v3733_v10  ;;  %v1632_v48 = vmul.f32 %v3488_v52, %v1596_v13  ;;  %v1717_v34 = vpop.permute.xlu0 %1716 }
 0x490   :  { %v1579_v29 = vmul.f32 %v2343_v61, %v3735_v32  ;;  %v2345_v49 = vpop.eup %2344  ;;  %v1844_v63 = vmax.f32 %v1812_v25, 0.0  ;;  %v1614_v5 = vmul.f32 %v3488_v52, %v1578_v0 }
 0x491   :  { %v2347_v20 = vpop.eup %2346  ;;  %v1633_v14 = vmul.f32 %v3488_v52, %v1597_v9  ;;  %v1594_v53 = vmul.f32 %v2345_v49, %v3736_v8  ;;  %v1668_v12 = vadd.f32 %v3496_v40, %v1632_v48 }
 0x492   :  { %v1615_v18 = vmul.f32 %v3488_v52, %v1579_v29  ;;  %v2349_v24 = vpop.eup %2348  ;;  %v1595_v36 = vmul.f32 %v2347_v20, %v3737_v35  ;;  %v1650_v31 = vadd.f32 %v3496_v40, %v1614_v5 }
 0x493   :  { %v2351_v3 = vpop.eup %2350  ;;  %v1669_v58 = vadd.f32 %v3496_v40, %v1633_v14  ;;  %v1630_v45 = vmul.f32 %v3488_v52, %v1594_v53  ;;  %v1576_v44 = vmul.f32 %v2349_v24, %v3738_v11  ;;  %v1749_v47 = vpop.permute.xlu0 %1748  ;;  %v3745_v11 = vld [vmem:[#allocation26_spill] sm:$0xff] }
 0x494   :  { %v1651_v43 = vadd.f32 %v3496_v40, %v1615_v18  ;;  %v2353_v41 = vpop.eup %2352  ;;  %v1631_v15 = vmul.f32 %v3488_v52, %v1595_v36  ;;  %v1577_v16 = vmul.f32 %v2351_v3, %v3739_v22  ;;  %v3744_v36 = vld [vmem:[#allocation25_spill] sm:$0xff] }
 0x495   :  { %v2355_v33 = vpop.eup %2354  ;;  %v1666_v28 = vadd.f32 %v3496_v40, %v1630_v45  ;;  %v1612_v13 = vmul.f32 %v3488_v52, %v1576_v44 }
 0x496   :  { %v2357_v25 = vpop.eup %2356  ;;  %v1667_v0 = vadd.f32 %v3496_v40, %v1631_v15 }
 0x497   :  { %v2359_v29 = vpop.eup %2358  ;;  %v1826_v54 = vadd.f32 %v3578_v51, %v1666_v28  ;;  %v1574_v2 = vmul.f32 %v2357_v25, %v3742_v39  ;;  %v1713_v8 = vpop.permute.xlu0 %1712  ;;  %v3743_v51 = vld [vmem:[#allocation20_spill] sm:$0xff]  ;;  %v3749_v39 = vld [vmem:[#allocation34_spill] sm:$0xff] }
 0x498   :  { %v1385_v27 = vpop.xlane.xlu1 %1384  ;;  %v2361_v5 = vpop.eup %2360 }
 0x499   :  { %v1477_v62 = vmul.f32 0.03125, %v1385_v27  ;;  %v1810_v27 = vadd.f32 %v3568_v21, %v1650_v31  ;;  %v1613_v21 = vmul.f32 %v3488_v52, %v1577_v16  ;;  %v2363_v18 = vpop.eup %2362  ;;  %v1858_v24 = vmax.f32 %v1826_v54, 0.0 }
 0x49a   :  { %v1610_v55 = vmul.f32 %v3488_v52, %v1574_v2  ;;  %v1590_v3 = vmul.f32 %v2361_v5, %v3744_v36  ;;  %v1591_v44 = vmul.f32 %v2363_v18, %v3745_v11 }
 0x49b   :  { %v1509_v42 = vadd.f32 1e-05, %v1477_v62  ;;  %v1842_v49 = vmax.f32 %v1810_v27, 0.0 }
 0x49c   :  { %v1727_v30 = vpop.permute.xlu1 %1726  ;;  %v1626_v22 = vmul.f32 %v3488_v52, %v1590_v3 }
 0x49d   :  { %v1813_v4 = vadd.f32 %v1727_v30, %v1653_v38  ;;  %2366 = vrsqrt.f32 %v1509_v42  ;;  %v3740_v38 = vld [vmem:[#allocation29_spill] sm:$0xff]  ;;  %v3741_v30 = vld [vmem:[#allocation30_spill] sm:$0xff] }
 0x49e   :  { %2368 = vrsqrt.f32 %v1524_v56  ;;  %v1592_v10 = vmul.f32 %v2353_v41, %v3740_v38  ;;  %v1593_v32 = vmul.f32 %v2355_v33, %v3741_v30  ;;  %v1646_v41 = vadd.f32 %v3496_v40, %v1610_v55 }
 0x49f   :  { %v1845_v60 = vmax.f32 %v1813_v4, 0.0  ;;  %2370 = vrsqrt.f32 %v1525_v6  ;;  %v1745_v6 = vpop.permute.xlu0 %1744 }
 0x4a0   :  { %v1757_v59 = vpop.permute.xlu1 %1756  ;;  %v1628_v62 = vmul.f32 %v3488_v52, %v1592_v10  ;;  %v1629_v53 = vmul.f32 %v3488_v52, %v1593_v32  ;;  %v3747_v10 = vld [vmem:[#allocation35_spill] sm:$0xff] }
 0x4a1   :  { %v1874_v37 = vpack.c.bf16 %v1845_v60, %v1844_v63  ;;  %v1828_v17 = vadd.f32 %v1757_v59, %v1668_v12  ;;  %v1648_v63 = vadd.f32 %v3496_v40, %v1612_v13  ;;  %v1575_v59 = vmul.f32 %v2359_v29, %v3743_v51 }
 0x4a2   :  { %v1649_v12 = vadd.f32 %v3496_v40, %v1613_v21  ;;  %v1664_v35 = vadd.f32 %v3496_v40, %v1628_v62  ;;  %v1627_v13 = vmul.f32 %v3488_v52, %v1591_v44  ;;  %v3748_v21 = vld [vmem:[#allocation33_spill] sm:$0xff] }
 0x4a3   :  { %v1860_v61 = vmax.f32 %v1828_v17, 0.0  ;;  %v1904_v48 = vsel %vm1186_vm3, %v1874_v37, 0  ;;  %v1808_v1 = vadd.f32 %v1717_v34, %v1648_v63  ;;  %v1611_v45 = vmul.f32 %v3488_v52, %v1575_v59 }
 0x4a4   :  { %v1759_v23 = vpop.permute.xlu1 %1758  ;;  %v1824_v56 = vadd.f32 %v1749_v47, %v1664_v35 }
 0x4a5   :  { %v1829_v46 = vadd.f32 %v1759_v23, %v1669_v58  ;;  %v1665_v58 = vadd.f32 %v3496_v40, %v1629_v53  ;;  %v2365_v23 = vpop.eup %2364  ;;  %v1840_v34 = vmax.f32 %v1808_v1, 0.0  ;;  %v1647_v38 = vadd.f32 %v3496_v40, %v1611_v45 }
 0x4a7   :  { %v1861_v26 = vmax.f32 %v1829_v46, 0.0 }
 0x4a8   :  { %v1723_v7 = vpop.permute.xlu1 %1722 }
 0x4a9   :  { %v1882_v9 = vpack.c.bf16 %v1861_v26, %v1860_v61  ;;  %v1811_v50 = vadd.f32 %v1723_v7, %v1651_v43  ;;  %v1806_v61 = vadd.f32 %v1713_v8, %v1646_v41  ;;  %v3746_v26 = vld [vmem:[#allocation32_spill] sm:$0xff]  ;;  %v1856_v7 = vmax.f32 %v1824_v56, 0.0 }
 0x4aa   :  { %v2367_v43 = vpop.eup %2366  ;;  %v1572_v28 = vmul.f32 %v2365_v23, %v3746_v26 }
 0x4ab   :  { %v1843_v4 = vmax.f32 %v1811_v50, 0.0  ;;  %2214 = vmatprep.subr.msk.bf16.mxu0 %vm1186_vm3, %v1882_v9  ;;  %v2369_v27 = vpop.eup %2368  ;;  %v1573_v9 = vmul.f32 %v2367_v43, %v3747_v10  ;;  %v1986_v43 = vlaneseq }
 0x4ac   :  { %v1755_v20 = vpop.permute.xlu1 %1754  ;;  %2123 = vmatpush3.bf16.xpose.msra.mxu0 %v1904_v48  ;;  %v2371_v47 = vpop.eup %2370  ;;  %v1588_v30 = vmul.f32 %v2369_v27, %v3748_v21  ;;  %v1608_v54 = vmul.f32 %v3488_v52, %v1572_v28  ;;  %v1663_v48 = vadd.f32 %v3496_v40, %v1627_v13 }
 0x4ad   :  { %v1873_v60 = vpack.c.bf16 %v1843_v4, %v1842_v49  ;;  %v1827_v14 = vadd.f32 %v1755_v20, %v1667_v0  ;;  %v1662_v0 = vadd.f32 %v3496_v40, %v1626_v22  ;;  %v1838_v49 = vmax.f32 %v1806_v61, 0.0  ;;  %v1709_v4 = vpop.permute.xlu0 %1708 }
 0x4ae   :  { %v1589_v2 = vmul.f32 %v2371_v47, %v3749_v39  ;;  %v1624_v5 = vmul.f32 %v3488_v52, %v1588_v30  ;;  %v1644_v51 = vadd.f32 %v3496_v40, %v1608_v54  ;;  %vm2000_vm4 = vcmp.lt.s32.totalorder %v1986_v43, 256 }
 0x4af   :  { %v1859_v37 = vmax.f32 %v1827_v14, 0.0  ;;  %v1901_v46 = vsel %vm1186_vm3, %v1873_v60, 0  ;;  %v1822_v20 = vadd.f32 %v1745_v6, %v1662_v0  ;;  %v1609_v60 = vmul.f32 %v3488_v52, %v1573_v9 }
 0x4b0   :  { %v1719_v57 = vpop.permute.xlu1 %1718  ;;  %v1625_v1 = vmul.f32 %v3488_v52, %v1589_v2  ;;  %v1804_v55 = vadd.f32 %v1709_v4, %v1644_v51  ;;  %v1987_v6 = vshrl.u32 %v1986_v43, 7 }
 0x4b1   :  { %v1881_v42 = vpack.c.bf16 %v1859_v37, %v1858_v24  ;;  %v1809_v17 = vadd.f32 %v1719_v57, %v1649_v12  ;;  %v1854_v59 = vmax.f32 %v1822_v20, 0.0  ;;  %v1645_v24 = vadd.f32 %v3496_v40, %v1609_v60  ;;  %v1741_v37 = vpop.permute.xlu0 %1740 }
 0x4b2   :  { %v1660_v57 = vadd.f32 %v3496_v40, %v1624_v5  ;;  %v1836_v11 = vmax.f32 %v1804_v55, 0.0 }
 0x4b3   :  { %v1841_v31 = vmax.f32 %v1809_v17, 0.0  ;;  %2215 = vmatprep.subr.msk.bf16.mxu0 %vm1186_vm3, %v1881_v42  ;;  %v1661_v17 = vadd.f32 %v3496_v40, %v1625_v1 }
 0x4b4   :  { %v1751_v15 = vpop.permute.xlu1 %1750  ;;  %2125 = vmatpush3.bf16.xpose.msra.mxu0 %v1901_v46  ;;  %v1820_v3 = vadd.f32 %v1741_v37, %v1660_v57  ;;  %v2395_v46 = vmov 1966171168  }
 0x4b5   :  { %v1872_v16 = vpack.c.bf16 %v1841_v31, %v1840_v34  ;;  %v1825_v33 = vadd.f32 %v1751_v15, %v1665_v58  ;;  %v1984_v40 = vunpack.c.l.s4 %v2395_v46  ;;  %v1887_v15 = vstv %s3658_s4 }
 0x4b6   :  { %v1852_v52 = vmax.f32 %v1820_v3, 0.0 }
 0x4b7   :  { %v1857_v25 = vmax.f32 %v1825_v33, 0.0  ;;  %v1898_v62 = vsel %vm1186_vm3, %v1872_v16, 0  ;;  %v1985_v41 = vunpack.c.0.s8 %v1984_v40 }
 0x4b8   :  { %v1715_v50 = vpop.permute.xlu1 %1714 }
 0x4b9   :  { %v1880_v32 = vpack.c.bf16 %v1857_v25, %v1856_v7  ;;  %v1807_v29 = vadd.f32 %v1715_v50, %v1647_v38  ;;  %v1988_v61 = vsub.s32 %v1985_v41, %v1987_v6 }
 0x4bb   :  { %v1839_v63 = vmax.f32 %v1807_v29, 0.0  ;;  %2216 = vmatprep.subr.msk.bf16.mxu0 %vm1186_vm3, %v1880_v32 }
 0x4bc   :  { %v1747_v14 = vpop.permute.xlu1 %1746  ;;  %2127 = vmatpush3.bf16.xpose.msra.mxu0 %v1898_v62 }
 0x4bd   :  { %v1871_v8 = vpack.c.bf16 %v1839_v63, %v1838_v49  ;;  %v1823_v53 = vadd.f32 %v1747_v14, %v1663_v48 }
 0x4bf   :  { %v1855_v18 = vmax.f32 %v1823_v53, 0.0  ;;  %v1895_v58 = vsel %vm1186_vm3, %v1871_v8, 0 }
 0x4c0   :  { %v1711_v12 = vpop.permute.xlu1 %1710 }
 0x4c1   :  { %v1879_v35 = vpack.c.bf16 %v1855_v18, %v1854_v59  ;;  %v1805_v36 = vadd.f32 %v1711_v12, %v1645_v24 }
 0x4c3   :  { %v1837_v42 = vmax.f32 %v1805_v36, 0.0  ;;  %2217 = vmatprep.subr.msk.bf16.mxu0 %vm1186_vm3, %v1879_v35 }
 0x4c4   :  { %v1743_v45 = vpop.permute.xlu1 %1742  ;;  %2129 = vmatpush3.bf16.xpose.msra.mxu0 %v1895_v58 }
 0x4c5   :  { %v1821_v44 = vadd.f32 %v1743_v45, %v1661_v17  ;;  %v1870_v23 = vpack.c.bf16 %v1837_v42, %v1836_v11 }
 0x4c7   :  { %v1853_v34 = vmax.f32 %v1821_v44, 0.0  ;;  %v1892_v31 = vsel %vm1186_vm3, %v1870_v23, 0 }
 0x4c9   :  { %v1878_v56 = vpack.c.bf16 %v1853_v34, %v1852_v52 }
 0x4cb   :  { %2218 = vmatprep.subr.msk.bf16.mxu0 %vm1186_vm3, %v1878_v56 }
 0x4cc   :  { %2131 = vmatpush3.bf16.xpose.msra.mxu0 %v1892_v31 }
 0x4d3   :  { %2133 = vmatmul.mubr.msk.bf16.vlgmr.msra.gmra.mxu0 %vm1186_vm3, %v3472_v19 }
 0x593   :  { %v1973_v22 = vpop.f32.mrf.mxu0 }
 0x594   :  { %v1974_v33 = vadd.f32 %v1973_v22, %v1887_v15 }
 0x595   :  { %v1975_v16 = vpop.f32.mrf.mxu0 }
 0x596   :  { %v1976_v27 = vadd.f32 %v1975_v16, %v1887_v15 }
 0x597   :  { %v1977_v26 = vpop.f32.mrf.mxu0 }
 0x598   :  { %v1982_v28 = vcombine.low %v1974_v33, %v1976_v27 }
 0x599   :  { %v1978_v13 = vpop.f32.mrf.mxu0 }
 0x59a   :  { %v1989_v19 = vrot.slane %v1982_v28, %v1988_v61 }
 0x59c   :  { %v1996_v47 = vrot.slane %v1989_v19, %v1988_v61 }
 0x59e   :  { %2002 = vst.msk [vmem:[#allocation3] sm:$0x3] %vm2000_vm4, %v1996_v47 }
 0x59f   :  { %2383 = shalt.err (!%p2380_p4)
}
 0x5a0   :  { %2012 = dma.vmem_to_hbm [thread:$0]  %s2010_s25, 32, %s3659_s5, [#allocation4]  }
 0x5a1   :  { %2392 = dma.done.wait [#allocation4], 32  }
 0x5a2   :  { %2393 = vsyncadd [#allocation4], 4294967264 }
 0x5a3   :  { %2016 = vsyncpa [#allocation4], 1 }

</bundles_post_ra>
